<compile_context>
chip_gen: v7x
topology: tpu7x:2x2x1
jax: 0.10.0
libtpu: 0.0.40
codegen_flags: <defaults>
</compile_context>

<pallas_src>
import functools

import jax
import jax.numpy as jnp
from jax import lax
from jax.experimental import pallas as pl
from jax.experimental.pallas import tpu as pltpu


# ---------------------------------------------------------------------------
# Pallas kernel: Conv2d(stride=1, pad) + bias + ReLU, taps folded into K
# ---------------------------------------------------------------------------
def _conv_kernel(main_ref, halo_ref, w_ref, b_ref, o_ref, win_ref, acc_ref,
                 *, kw, tm):
    """main_ref: (KH*Cin, tm) bf16; halo_ref: (KH*Cin, 128) bf16;
    w_ref: (KW, Cout, KH*Cin) bf16; b_ref: (Cout, 1) f32;
    o_ref: (Cout, tm) bf16; win_ref/acc_ref: VMEM scratch."""
    # Assemble the contiguous lane window (KH*Cin, tm + 128); both stores are
    # lane-aligned (offsets 0 and tm, multiples of 128).
    win_ref[:, :tm] = main_ref[...]
    win_ref[:, tm:] = halo_ref[...]
    # KW folded-K matmuls: (Cout, KH*Cin) x (KH*Cin, tm), f32 accumulation in
    # a VMEM scratch (only KW accumulate rounds).
    for j in range(kw):
        part = jnp.dot(w_ref[j], win_ref[:, j:j + tm],
                       preferred_element_type=jnp.float32)
        if j == 0:
            acc_ref[...] = part
        else:
            acc_ref[...] += part
    o_ref[...] = jnp.maximum(acc_ref[...] + b_ref[...], 0.0).astype(o_ref.dtype)


def conv2d_relu_pallas(x_cm, w_kw, b, *, kh, kw, pad, tm):
    """x_cm: (Cin, N, H, W) bf16 channel-major.
    w_kw:  (KW, Cout, KH*Cin) with w_kw[j, o, i*Cin + c] == torch_w[o, c, i, j].
    Returns relu(conv2d(x) + b) as (Cout, N, Ho, Wo) bf16 channel-major."""
    cin, n, h, w_sp = x_cm.shape
    kw2, cout, khcin = w_kw.shape
    assert kw2 == kw and khcin == kh * cin and tm % 128 == 0
    hp, wp = h + 2 * pad, w_sp + 2 * pad
    ho, wo = hp - kh + 1, wp - kw + 1

    s = n * hp * wp                              # flattened padded positions
    n_tiles = pl.cdiv(s, tm)
    l_main = n_tiles * tm
    l_rows = l_main + 128                        # + one lane-aligned halo block
    total = (kh - 1) * wp + l_rows               # flat length needed for row shifts

    # Spatial pad, flatten channel-major, tail-pad to cover row shifts + halo.
    xp = jnp.pad(x_cm.astype(jnp.bfloat16),
                 ((0, 0), (0, 0), (pad, pad), (pad, pad)))
    xf = jnp.pad(xp.reshape(cin, s), ((0, 0), (0, total - s)))
    # KH row-shifted stack: xrows[i*Cin + c, q] = xf[c, q + i*Wp].  Single XLA
    # copy that folds the KH kernel rows into the MXU contraction dimension.
    xrows = jnp.concatenate([xf[:, i * wp: i * wp + l_rows] for i in range(kh)],
                            axis=0)

    halo_blk = tm // 128
    yg = pl.pallas_call(
        functools.partial(_conv_kernel, kw=kw, tm=tm),
        out_shape=jax.ShapeDtypeStruct((cout, l_main), jnp.bfloat16),
        grid_spec=pltpu.PrefetchScalarGridSpec(
            num_scalar_prefetch=0,
            grid=(n_tiles,),
            in_specs=[
                pl.BlockSpec((khcin, tm), lambda m: (0, m)),
                pl.BlockSpec((khcin, 128), lambda m: (0, (m + 1) * halo_blk)),
                pl.BlockSpec((kw, cout, khcin), lambda m: (0, 0, 0)),
                pl.BlockSpec((cout, 1), lambda m: (0, 0)),
            ],
            out_specs=pl.BlockSpec((cout, tm), lambda m: (0, m)),
            scratch_shapes=[
                pltpu.VMEM((khcin, tm + 128), jnp.bfloat16),   # lane window
                pltpu.VMEM((cout, tm), jnp.float32),           # f32 accumulator
            ],
        ),
        compiler_params=pltpu.CompilerParams(
            dimension_semantics=("parallel",),
            vmem_limit_bytes=32 * 1024 * 1024,
        ),
    )(xrows, xrows, w_kw.astype(jnp.bfloat16),
      b.reshape(cout, 1).astype(jnp.float32))

    # Drop the "garbage" columns of the Wp-stride trick; stay channel-major.
    y = yg[:, :s].reshape(cout, n, hp, wp)
    return y[:, :, :ho, :wo]


# ---------------------------------------------------------------------------
# Pallas kernel: fused d1 -> relu -> d2 -> relu -> d3 head (K-split reduction)
# ---------------------------------------------------------------------------
def _mlp_kernel(x_ref, w1_ref, b1_ref, w2_ref, b2_ref, w3_ref, b3_ref,
                o_ref, acc_ref):
    k = pl.program_id(0)

    @pl.when(k == 0)
    def _():
        acc_ref[...] = jnp.zeros_like(acc_ref)

    acc_ref[...] += jnp.dot(x_ref[...], w1_ref[...],
                            preferred_element_type=jnp.float32)

    @pl.when(k == pl.num_programs(0) - 1)
    def _():
        h = jnp.maximum(acc_ref[...] + b1_ref[...], 0.0).astype(jnp.bfloat16)
        h = jnp.maximum(
            jnp.dot(h, w2_ref[...], preferred_element_type=jnp.float32)
            + b2_ref[...], 0.0).astype(jnp.bfloat16)
        o_ref[...] = (jnp.dot(h, w3_ref[...], preferred_element_type=jnp.float32)
                      + b3_ref[...])


def mlp_head_pallas(x, w1, b1, w2, b2, w3, b3, *, k_steps=2):
    m, k1 = x.shape
    n1, n2, n3 = w1.shape[1], w2.shape[1], w3.shape[1]
    k_chunk = (-(-k1 // (k_steps * 128))) * 128
    k_pad = k_chunk * k_steps
    xb = jnp.pad(x.astype(jnp.bfloat16), ((0, 0), (0, k_pad - k1)))
    w1b = jnp.pad(w1.astype(jnp.bfloat16), ((0, k_pad - k1), (0, 0)))
    return pl.pallas_call(
        _mlp_kernel,
        out_shape=jax.ShapeDtypeStruct((m, n3), jnp.float32),
        grid_spec=pltpu.PrefetchScalarGridSpec(
            num_scalar_prefetch=0,
            grid=(k_steps,),
            in_specs=[
                pl.BlockSpec((m, k_chunk), lambda k: (0, k)),
                pl.BlockSpec((k_chunk, n1), lambda k: (k, 0)),
                pl.BlockSpec((1, n1), lambda k: (0, 0)),
                pl.BlockSpec((n1, n2), lambda k: (0, 0)),
                pl.BlockSpec((1, n2), lambda k: (0, 0)),
                pl.BlockSpec((n2, n3), lambda k: (0, 0)),
                pl.BlockSpec((1, n3), lambda k: (0, 0)),
            ],
            out_specs=pl.BlockSpec((m, n3), lambda k: (0, 0)),
            scratch_shapes=[pltpu.VMEM((m, n1), jnp.float32)],
        ),
        compiler_params=pltpu.CompilerParams(
            dimension_semantics=("arbitrary",),
            vmem_limit_bytes=32 * 1024 * 1024,
        ),
    )(xb, w1b,
      b1.reshape(1, -1).astype(jnp.float32),
      w2.astype(jnp.bfloat16), b2.reshape(1, -1).astype(jnp.float32),
      w3.astype(jnp.bfloat16), b3.reshape(1, -1).astype(jnp.float32))


def maxpool3s2(x):
    # TODO(synk): overlapping 3x3 / stride-2 max-pool kept as XLA glue
    # (lax.reduce_window) -- a tiny fraction of bytes/FLOPs vs the convs.
    return lax.reduce_window(
        x, jnp.array(-jnp.inf, dtype=x.dtype), lax.max,
        window_dimensions=(1, 1, 3, 3),
        window_strides=(1, 1, 2, 2),
        padding="VALID")


# ---------------------------------------------------------------------------
# Parameters (deterministic, shapes from StartingCNNR2.__init__)
# ---------------------------------------------------------------------------
def init_params(key, channels, num_classes):
    ks = jax.random.split(key, 14)

    def conv_w(k, kh, kw, cin, cout):
        fan_in = kh * kw * cin
        return (jax.random.normal(k, (kw, cout, kh * cin), jnp.float32)
                * (2.0 / fan_in) ** 0.5)

    def lin_w(k, fin, fout):
        return jax.random.normal(k, (fin, fout), jnp.float32) * (2.0 / fin) ** 0.5

    def bias(k, nf):
        return 0.01 * jax.random.normal(k, (nf,), jnp.float32)

    return {
        "w1": conv_w(ks[0], 6, 6, channels, 6), "b1": bias(ks[1], 6),
        "w2": conv_w(ks[2], 6, 6, 6, 12),       "b2": bias(ks[3], 12),
        "w3": conv_w(ks[4], 3, 3, 12, 36),      "b3": bias(ks[5], 36),
        "w4": conv_w(ks[6], 3, 3, 36, 36),      "b4": bias(ks[7], 36),
        "wd1": lin_w(ks[8], 36 * 14 * 14, 120), "bd1": bias(ks[9], 120),
        "wd2": lin_w(ks[10], 120, 84),          "bd2": bias(ks[11], 84),
        "wd3": lin_w(ks[12], 84, num_classes),  "bd3": bias(ks[13], num_classes),
    }


# ---------------------------------------------------------------------------
# Forward pass (mirrors StartingCNNR2.forward; input is PyTorch NCHW)
# ---------------------------------------------------------------------------
def starting_cnn_r2_forward(params, x_nchw):
    # Channel-major bf16 activations end-to-end (no NCHW / f32 round trips).
    x = jnp.transpose(x_nchw, (1, 0, 2, 3)).astype(jnp.bfloat16)
    x = maxpool3s2(conv2d_relu_pallas(x, params["w1"], params["b1"],
                                      kh=6, kw=6, pad=2, tm=8192))
    x = maxpool3s2(conv2d_relu_pallas(x, params["w2"], params["b2"],
                                      kh=6, kw=6, pad=2, tm=4096))
    x = maxpool3s2(conv2d_relu_pallas(x, params["w3"], params["b3"],
                                      kh=3, kw=3, pad=2, tm=1024))
    x = maxpool3s2(conv2d_relu_pallas(x, params["w4"], params["b4"],
                                      kh=3, kw=3, pad=2, tm=1024))
    # TODO(synk): Dropout2d(0.4) is train-time stochastic; eval-mode identity here.
    n = x.shape[1]
    x = jnp.transpose(x, (1, 0, 2, 3)).reshape(n, -1)   # == nn.Flatten() on NCHW
    return mlp_head_pallas(x, params["wd1"], params["bd1"],
                           params["wd2"], params["bd2"],
                           params["wd3"], params["bd3"])


# ---------------------------------------------------------------------------
# Self-checks + demo
# ---------------------------------------------------------------------------
def _conv_ref_nchw(x, w_kw, b, kh, kw, pad):
    kw2, cout, khcin = w_kw.shape
    cin = khcin // kh
    w_oihw = w_kw.reshape(kw, cout, kh, cin).transpose(1, 3, 2, 0)
    y = lax.conv_general_dilated(
        x, w_oihw, window_strides=(1, 1), padding=((pad, pad), (pad, pad)),
        dimension_numbers=("NCHW", "OIHW", "NCHW"))
    return jnp.maximum(y + b.reshape(1, -1, 1, 1), 0.0)


def _check_conv(w_kw, b, kh, kw, cin, tm, spatial, seed):
    x = jax.random.normal(jax.random.PRNGKey(seed),
                          (2, cin, spatial, spatial), jnp.float32)
    x_cm = jnp.transpose(x, (1, 0, 2, 3)).astype(jnp.bfloat16)
    got = conv2d_relu_pallas(x_cm, w_kw, b, kh=kh, kw=kw, pad=2, tm=tm)
    got = jnp.transpose(got, (1, 0, 2, 3)).astype(jnp.float32)
    ref = _conv_ref_nchw(x, w_kw, b, kh, kw, 2)
    rel = float(jnp.max(jnp.abs(got - ref)) / (jnp.max(jnp.abs(ref)) + 1e-6))
    assert rel < 0.05, f"pallas conv mismatch (kh={kh}, cin={cin}): rel err {rel}"


if __name__ == "__main__":
    # pic_size=224 is what the forward implies: after 4x (conv + 3x3/s2 pool)
    # the spatial size is 14, matching nn.Linear(36 * 14 * 14, 120).
    channels, pic_size, num_classes, batch = 3, 224, 10, 2

    key = jax.random.PRNGKey(0)
    pkey, xkey = jax.random.split(key)
    params = init_params(pkey, channels, num_classes)

    # Numerical sanity checks of the Pallas conv against XLA's conv
    # (bf16 compute vs f32 reference -> loose 5% max-relative tolerance).
    _check_conv(params["w1"], params["b1"], kh=6, kw=6, cin=channels,
                tm=1024, spatial=32, seed=1)
    _check_conv(params["w4"], params["b4"], kh=3, kw=3, cin=36,
                tm=512, spatial=16, seed=2)

    x = jax.random.normal(xkey, (batch, channels, pic_size, pic_size), jnp.float32)
    fwd = jax.jit(starting_cnn_r2_forward)
    out = jax.block_until_ready(fwd(params, x))
    assert out.shape == (batch, num_classes), out.shape
    assert bool(jnp.all(jnp.isfinite(out)))
    print("KERNEL_OK")
</pallas_src>

<mosaic_0001>
module attributes {stable_mosaic.version = 11 : i64} {
  func.func @_conv_kernel(%arg0: i32, %arg1: memref<18x1024xbf16, #tpu.memory_space<vmem>>, %arg2: memref<18x128xbf16, #tpu.memory_space<vmem>>, %arg3: memref<6x6x18xbf16, #tpu.memory_space<vmem>>, %arg4: memref<6x1xf32, #tpu.memory_space<vmem>>, %arg5: memref<6x1024xbf16, #tpu.memory_space<vmem>>, %arg6: memref<18x1152xbf16, #tpu.memory_space<vmem>>, %arg7: memref<6x1024xf32, #tpu.memory_space<vmem>>) attributes {dimension_semantics = [#tpu.dimension_semantics<parallel>], iteration_bounds = array<i64: 3>, scalar_prefetch = 0 : i64, scratch_operands = 2 : i64, tpu.core_type = #tpu.core_type<tc>, window_params = [{transform_indices = @transform_0, window_bounds = array<i64: 18, 1024>}, {transform_indices = @transform_1, window_bounds = array<i64: 18, 128>}, {pipeline_mode = #tpu.pipeline_mode<synchronous>, transform_indices = @transform_2, window_bounds = array<i64: 6, 6, 18>}, {pipeline_mode = #tpu.pipeline_mode<synchronous>, transform_indices = @transform_3, window_bounds = array<i64: 6, 1>}, {transform_indices = @transform_4, window_bounds = array<i64: 6, 1024>}]} {
    %c0 = arith.constant 0 : index
    %c0_0 = arith.constant 0 : index
    %0 = vector.load %arg1[%c0, %c0_0] : memref<18x1024xbf16, #tpu.memory_space<vmem>>, vector<18x1024xbf16>
    %c0_1 = arith.constant 0 : index
    %c0_2 = arith.constant 0 : index
    %1 = vector.load %arg6[%c0_1, %c0_2] : memref<18x1152xbf16, #tpu.memory_space<vmem>>, vector<18x1024xbf16>
    tpu.vector_store %arg6[%c0_1, %c0_2], %0 {strides = array<i32>} : memref<18x1152xbf16, #tpu.memory_space<vmem>>, vector<18x1024xbf16>,
    %c0_3 = arith.constant 0 : index
    %c0_4 = arith.constant 0 : index
    %2 = vector.load %arg2[%c0_3, %c0_4] : memref<18x128xbf16, #tpu.memory_space<vmem>>, vector<18x128xbf16>
    %c0_5 = arith.constant 0 : index
    %c1024 = arith.constant 1024 : index
    %3 = vector.load %arg6[%c0_5, %c1024] : memref<18x1152xbf16, #tpu.memory_space<vmem>>, vector<18x128xbf16>
    tpu.vector_store %arg6[%c0_5, %c1024], %2 {strides = array<i32>} : memref<18x1152xbf16, #tpu.memory_space<vmem>>, vector<18x128xbf16>,
    %c0_6 = arith.constant 0 : index
    %c0_7 = arith.constant 0 : index
    %c0_8 = arith.constant 0 : index
    %4 = vector.load %arg3[%c0_6, %c0_7, %c0_8] : memref<6x6x18xbf16, #tpu.memory_space<vmem>>, vector<1x6x18xbf16>
    %5 = vector.shape_cast %4 : vector<1x6x18xbf16> to vector<6x18xbf16>
    %c0_9 = arith.constant 0 : index
    %c0_10 = arith.constant 0 : index
    %6 = vector.load %arg6[%c0_9, %c0_10] : memref<18x1152xbf16, #tpu.memory_space<vmem>>, vector<18x1024xbf16>
    %cst = arith.constant dense<0.000000e+00> : vector<6x1024xf32>
    %7 = tpu.matmul %5, %6, %cst {dimension_numbers = #tpu.dot_dimension_numbers<[1], [0], [0], [1], [0, 0, 1, 1], [], []>} : vector<6x18xbf16>, vector<18x1024xbf16>, vector<6x1024xf32> -> vector<6x1024xf32>
    %c0_11 = arith.constant 0 : index
    %c0_12 = arith.constant 0 : index
    %8 = vector.load %arg7[%c0_11, %c0_12] : memref<6x1024xf32, #tpu.memory_space<vmem>>, vector<6x1024xf32>
    tpu.vector_store %arg7[%c0_11, %c0_12], %7 {strides = array<i32>} : memref<6x1024xf32, #tpu.memory_space<vmem>>, vector<6x1024xf32>,
    %c1 = arith.constant 1 : index
    %c0_13 = arith.constant 0 : index
    %c0_14 = arith.constant 0 : index
    %9 = vector.load %arg3[%c1, %c0_13, %c0_14] : memref<6x6x18xbf16, #tpu.memory_space<vmem>>, vector<1x6x18xbf16>
    %10 = vector.shape_cast %9 : vector<1x6x18xbf16> to vector<6x18xbf16>
    %c0_15 = arith.constant 0 : index
    %c1_16 = arith.constant 1 : index
    %11 = vector.load %arg6[%c0_15, %c1_16] : memref<18x1152xbf16, #tpu.memory_space<vmem>>, vector<18x1024xbf16>
    %cst_17 = arith.constant dense<0.000000e+00> : vector<6x1024xf32>
    %12 = tpu.matmul %10, %11, %cst_17 {dimension_numbers = #tpu.dot_dimension_numbers<[1], [0], [0], [1], [0, 0, 1, 1], [], []>} : vector<6x18xbf16>, vector<18x1024xbf16>, vector<6x1024xf32> -> vector<6x1024xf32>
    %c0_18 = arith.constant 0 : index
    %c0_19 = arith.constant 0 : index
    %13 = vector.load %arg7[%c0_18, %c0_19] : memref<6x1024xf32, #tpu.memory_space<vmem>>, vector<6x1024xf32>
    %14 = arith.addf %13, %12 : vector<6x1024xf32>
    %c0_20 = arith.constant 0 : index
    %c0_21 = arith.constant 0 : index
    %15 = vector.load %arg7[%c0_20, %c0_21] : memref<6x1024xf32, #tpu.memory_space<vmem>>, vector<6x1024xf32>
    tpu.vector_store %arg7[%c0_20, %c0_21], %14 {strides = array<i32>} : memref<6x1024xf32, #tpu.memory_space<vmem>>, vector<6x1024xf32>,
    %c2 = arith.constant 2 : index
    %c0_22 = arith.constant 0 : index
    %c0_23 = arith.constant 0 : index
    %16 = vector.load %arg3[%c2, %c0_22, %c0_23] : memref<6x6x18xbf16, #tpu.memory_space<vmem>>, vector<1x6x18xbf16>
    %17 = vector.shape_cast %16 : vector<1x6x18xbf16> to vector<6x18xbf16>
    %c0_24 = arith.constant 0 : index
    %c2_25 = arith.constant 2 : index
    %18 = vector.load %arg6[%c0_24, %c2_25] : memref<18x1152xbf16, #tpu.memory_space<vmem>>, vector<18x1024xbf16>
    %cst_26 = arith.constant dense<0.000000e+00> : vector<6x1024xf32>
    %19 = tpu.matmul %17, %18, %cst_26 {dimension_numbers = #tpu.dot_dimension_numbers<[1], [0], [0], [1], [0, 0, 1, 1], [], []>} : vector<6x18xbf16>, vector<18x1024xbf16>, vector<6x1024xf32> -> vector<6x1024xf32>
    %c0_27 = arith.constant 0 : index
    %c0_28 = arith.constant 0 : index
    %20 = vector.load %arg7[%c0_27, %c0_28] : memref<6x1024xf32, #tpu.memory_space<vmem>>, vector<6x1024xf32>
    %21 = arith.addf %20, %19 : vector<6x1024xf32>
    %c0_29 = arith.constant 0 : index
    %c0_30 = arith.constant 0 : index
    %22 = vector.load %arg7[%c0_29, %c0_30] : memref<6x1024xf32, #tpu.memory_space<vmem>>, vector<6x1024xf32>
    tpu.vector_store %arg7[%c0_29, %c0_30], %21 {strides = array<i32>} : memref<6x1024xf32, #tpu.memory_space<vmem>>, vector<6x1024xf32>,
    %c3 = arith.constant 3 : index
    %c0_31 = arith.constant 0 : index
    %c0_32 = arith.constant 0 : index
    %23 = vector.load %arg3[%c3, %c0_31, %c0_32] : memref<6x6x18xbf16, #tpu.memory_space<vmem>>, vector<1x6x18xbf16>
    %24 = vector.shape_cast %23 : vector<1x6x18xbf16> to vector<6x18xbf16>
    %c0_33 = arith.constant 0 : index
    %c3_34 = arith.constant 3 : index
    %25 = vector.load %arg6[%c0_33, %c3_34] : memref<18x1152xbf16, #tpu.memory_space<vmem>>, vector<18x1024xbf16>
    %cst_35 = arith.constant dense<0.000000e+00> : vector<6x1024xf32>
    %26 = tpu.matmul %24, %25, %cst_35 {dimension_numbers = #tpu.dot_dimension_numbers<[1], [0], [0], [1], [0, 0, 1, 1], [], []>} : vector<6x18xbf16>, vector<18x1024xbf16>, vector<6x1024xf32> -> vector<6x1024xf32>
    %c0_36 = arith.constant 0 : index
    %c0_37 = arith.constant 0 : index
    %27 = vector.load %arg7[%c0_36, %c0_37] : memref<6x1024xf32, #tpu.memory_space<vmem>>, vector<6x1024xf32>
    %28 = arith.addf %27, %26 : vector<6x1024xf32>
    %c0_38 = arith.constant 0 : index
    %c0_39 = arith.constant 0 : index
    %29 = vector.load %arg7[%c0_38, %c0_39] : memref<6x1024xf32, #tpu.memory_space<vmem>>, vector<6x1024xf32>
    tpu.vector_store %arg7[%c0_38, %c0_39], %28 {strides = array<i32>} : memref<6x1024xf32, #tpu.memory_space<vmem>>, vector<6x1024xf32>,
    %c4 = arith.constant 4 : index
    %c0_40 = arith.constant 0 : index
    %c0_41 = arith.constant 0 : index
    %30 = vector.load %arg3[%c4, %c0_40, %c0_41] : memref<6x6x18xbf16, #tpu.memory_space<vmem>>, vector<1x6x18xbf16>
    %31 = vector.shape_cast %30 : vector<1x6x18xbf16> to vector<6x18xbf16>
    %c0_42 = arith.constant 0 : index
    %c4_43 = arith.constant 4 : index
    %32 = vector.load %arg6[%c0_42, %c4_43] : memref<18x1152xbf16, #tpu.memory_space<vmem>>, vector<18x1024xbf16>
    %cst_44 = arith.constant dense<0.000000e+00> : vector<6x1024xf32>
    %33 = tpu.matmul %31, %32, %cst_44 {dimension_numbers = #tpu.dot_dimension_numbers<[1], [0], [0], [1], [0, 0, 1, 1], [], []>} : vector<6x18xbf16>, vector<18x1024xbf16>, vector<6x1024xf32> -> vector<6x1024xf32>
    %c0_45 = arith.constant 0 : index
    %c0_46 = arith.constant 0 : index
    %34 = vector.load %arg7[%c0_45, %c0_46] : memref<6x1024xf32, #tpu.memory_space<vmem>>, vector<6x1024xf32>
    %35 = arith.addf %34, %33 : vector<6x1024xf32>
    %c0_47 = arith.constant 0 : index
    %c0_48 = arith.constant 0 : index
    %36 = vector.load %arg7[%c0_47, %c0_48] : memref<6x1024xf32, #tpu.memory_space<vmem>>, vector<6x1024xf32>
    tpu.vector_store %arg7[%c0_47, %c0_48], %35 {strides = array<i32>} : memref<6x1024xf32, #tpu.memory_space<vmem>>, vector<6x1024xf32>,
    %c5 = arith.constant 5 : index
    %c0_49 = arith.constant 0 : index
    %c0_50 = arith.constant 0 : index
    %37 = vector.load %arg3[%c5, %c0_49, %c0_50] : memref<6x6x18xbf16, #tpu.memory_space<vmem>>, vector<1x6x18xbf16>
    %38 = vector.shape_cast %37 : vector<1x6x18xbf16> to vector<6x18xbf16>
    %c0_51 = arith.constant 0 : index
    %c5_52 = arith.constant 5 : index
    %39 = vector.load %arg6[%c0_51, %c5_52] : memref<18x1152xbf16, #tpu.memory_space<vmem>>, vector<18x1024xbf16>
    %cst_53 = arith.constant dense<0.000000e+00> : vector<6x1024xf32>
    %40 = tpu.matmul %38, %39, %cst_53 {dimension_numbers = #tpu.dot_dimension_numbers<[1], [0], [0], [1], [0, 0, 1, 1], [], []>} : vector<6x18xbf16>, vector<18x1024xbf16>, vector<6x1024xf32> -> vector<6x1024xf32>
    %c0_54 = arith.constant 0 : index
    %c0_55 = arith.constant 0 : index
    %41 = vector.load %arg7[%c0_54, %c0_55] : memref<6x1024xf32, #tpu.memory_space<vmem>>, vector<6x1024xf32>
    %42 = arith.addf %41, %40 : vector<6x1024xf32>
    %c0_56 = arith.constant 0 : index
    %c0_57 = arith.constant 0 : index
    %43 = vector.load %arg7[%c0_56, %c0_57] : memref<6x1024xf32, #tpu.memory_space<vmem>>, vector<6x1024xf32>
    tpu.vector_store %arg7[%c0_56, %c0_57], %42 {strides = array<i32>} : memref<6x1024xf32, #tpu.memory_space<vmem>>, vector<6x1024xf32>,
    %c0_58 = arith.constant 0 : index
    %c0_59 = arith.constant 0 : index
    %44 = vector.load %arg7[%c0_58, %c0_59] : memref<6x1024xf32, #tpu.memory_space<vmem>>, vector<6x1024xf32>
    %c0_60 = arith.constant 0 : index
    %c0_61 = arith.constant 0 : index
    %45 = vector.load %arg4[%c0_60, %c0_61] : memref<6x1xf32, #tpu.memory_space<vmem>>, vector<6x1xf32>
    %46 = vector.broadcast %45 : vector<6x1xf32> to vector<6x1024xf32>
    %47 = arith.addf %44, %46 : vector<6x1024xf32>
    %cst_62 = arith.constant 0.000000e+00 : f32
    %48 = vector.broadcast %cst_62 : f32 to vector<6x1024xf32>
    %49 = arith.maximumf %47, %48 : vector<6x1024xf32>
    %50 = arith.truncf %49 : vector<6x1024xf32> to vector<6x1024xbf16>
    %c0_63 = arith.constant 0 : index
    %c0_64 = arith.constant 0 : index
    %51 = vector.load %arg5[%c0_63, %c0_64] : memref<6x1024xbf16, #tpu.memory_space<vmem>>, vector<6x1024xbf16>
    tpu.vector_store %arg5[%c0_63, %c0_64], %50 {strides = array<i32>} : memref<6x1024xbf16, #tpu.memory_space<vmem>>, vector<6x1024xbf16>,
    return
  }
  func.func @transform_0(%arg0: i32) -> (i32, i32) {
    %c0_i32 = arith.constant 0 : i32
    %c0_i32_0 = arith.constant 0 : i32
    return %c0_i32, %arg0 : i32, i32
  }
  func.func @transform_1(%arg0: i32) -> (i32, i32) {
    %c1_i32 = arith.constant 1 : i32
    %0 = arith.addi %arg0, %c1_i32 : i32
    %c8_i32 = arith.constant 8 : i32
    %1 = arith.muli %0, %c8_i32 : i32
    %c0_i32 = arith.constant 0 : i32
    %c0_i32_0 = arith.constant 0 : i32
    return %c0_i32, %1 : i32, i32
  }
  func.func @transform_2(%arg0: i32) -> (i32, i32, i32) {
    %c0_i32 = arith.constant 0 : i32
    %c0_i32_0 = arith.constant 0 : i32
    %c0_i32_1 = arith.constant 0 : i32
    %c0_i32_2 = arith.constant 0 : i32
    return %c0_i32, %c0_i32_0, %c0_i32_1 : i32, i32, i32
  }
  func.func @transform_3(%arg0: i32) -> (i32, i32) {
    %c0_i32 = arith.constant 0 : i32
    %c0_i32_0 = arith.constant 0 : i32
    %c0_i32_1 = arith.constant 0 : i32
    return %c0_i32, %c0_i32_0 : i32, i32
  }
  func.func @transform_4(%arg0: i32) -> (i32, i32) {
    %c0_i32 = arith.constant 0 : i32
    %c0_i32_0 = arith.constant 0 : i32
    return %c0_i32, %arg0 : i32, i32
  }
}

</mosaic_0001>

<bundles_post_ra>
// kernel: tpu_custom_call.1
= control target key start
LH: loop header
LB: loop body
LE: loop exit
PB: predicated region body
PF: predicated region fallthrough
CT: control target
= control target key end

     0   :  { %s3781_s0 = inlined_call_operand.hbm [shape: bf16[18,3200], index: 0, kind: input, shape index: {}]   ;;  %s3782_s1 = inlined_call_operand.hbm [shape: bf16[18,3200], index: 1, kind: input, shape index: {}]   ;;  %s3783_s2 = inlined_call_operand.hbm [shape: bf16[6,6,18], index: 2, kind: input, shape index: {}]   ;;  %s3784_s3 = inlined_call_operand.vmem [shape: f32[6,1], index: 3, kind: input, shape index: {}]   ;;  %s3785_s4 = inlined_call_operand.hbm [shape: bf16[6,3072], index: 4, kind: output, shape index: {}]  }
   0x1   :  { %3796 = sst [smem:[#allocation19_spill]] %s3781_s0 }
   0x2   :  { %3797 = sst [smem:[#allocation20_spill]] %s3783_s2 }
   0x3   :  { %9 = vsyncpa [#allocation5], 0 }
   0x4   :  { %11 = vsyncpa [#allocation5 + $0x1], 0 }
   0x5   :  { %12 = vsyncpa [#allocation8], 0 }
   0x6   :  { %14 = vsyncpa [#allocation8 + $0x1], 0 }
   0x7   :  { %15 = vsyncpa [#allocation6], 0 }
   0x8   :  { %17 = vsyncpa [#allocation6 + $0x1], 0  ;;  %s3115_s15 = smov 0   ;;  %s3117_s16 = smov 0  }
   0x9   :  { %s3119_s17 = smov 0   ;;  %s3121_s18 = smov 0  }
   0xa   :  { %s3123_s19 = smov 0   ;;  %s3125_s20 = smov 0  }
   0xb   :  { %s3127_s21 = smov 0  }
   0xc LB: > { %3798 = sst [smem:[#allocation15_spill]] %s3067_s20  ;;  %s3149_s22 = sadd.s32 4294967295, %s3071_s21   ;;  %s3071_s21 = sphi %s3127_s21, %s3822_s21   ;;  %s3067_s20 = sphi %s3125_s20, %s3825_s20   ;;  %s3063_s19 = sphi %s3123_s19, %s3830_s19   ;;  %s3059_s18 = sphi %s3121_s18, %s3829_s18   ;;  %s3055_s17 = sphi %s3119_s17, %s3828_s17   ;;  %s3051_s16 = sphi %s3117_s16, %s3827_s16   ;;  %s3047_s15 = sphi %s3115_s15, %s3826_s15  }
   0xd   : > { %s2544_s23 = sadd.s32 4294967294, %s3071_s21   ;;  %s3153_s24 = sadd.s32 1, %s3071_s21  }
   0xe   : > { %3799 = sst [smem:[#allocation16_spill]] %s3153_s24  ;;  %s30_s25 = sadd.s32 1, %s3067_s20 }
   0xf   : > { %s27_s26 = ssub.s32 %s3071_s21, %s3153_s24  ;;  %p37_p0 = scmp.ne.s32.totalorder %s3067_s20, %s3063_s19 }
  0x10   : > { %p28_p1 = scmp.eq.s32.totalorder %s27_s26, 0  ;;  %p38_p2 = scmp.eq.s32.totalorder %s3071_s21, 0 }
  0x11   : > { %p43_p3 = scmp.ne.s32.totalorder %s3063_s19, %s3059_s18  ;;  %p3788_p4 = scmp.eq.s32.totalorder %s3149_s22, 0 }
  0x12   : > { %s3165_s27 = scalar_select %p28_p1, %s3067_s20, %s30_s25  }
  0x13   : > { %p3172_p5 = por %p38_p2, %p37_p0  ;;  %p3181_p6 = por %p3788_p4, %p43_p3 }
  0x14   : > { %3800 = sst [smem:[#allocation17_spill]] %s3165_s27  ;;  %s3787_s30 = sshll.u32 %s3071_s21, 3 }
  0x15   : > { %s3801_s28 = scalar_select %p3172_p5, 1, 0 }
  0x16   : > { %s3802_s29 = scalar_select %p3181_p6, 1, 0 }
  0x17   : > { %s60_s5 = sadd.s32 1, %s3055_s17  ;;  %s2724_s6 = sadd.s32 8, %s3787_s30 }
  0x18   : > { %p67_p7 = scmp.ne.s32.totalorder %s3055_s17, %s3051_s16  ;;  %s2726_s7 = sadd.s32 8, %s2724_s6 }
  0x19   : > { %p73_p8 = scmp.ne.s32.totalorder %s3051_s16, %s3047_s15  ;;  %s57_s8 = ssub.s32 %s2724_s6, %s2726_s7 }
  0x1a   : > { %p3194_p9 = por %p67_p7, %p38_p2  ;;  %p58_p10 = scmp.eq.s32.totalorder %s57_s8, 0 }
  0x1b   : > { %p3200_p11 = por %p73_p8, %p3788_p4  ;;  %p139_p12 = scmp.eq.s32.totalorder %s3149_s22, 2 }
  0x1c   : > { %s3803_s9 = scalar_select %p3194_p9, 1, 0 }
  0x1d   : > { %s3804_s10 = scalar_select %p3200_p11, 1, 0 }
  0x1e   : > { %p145_p13 = scmp.eq.s32.totalorder %s2544_s23, 2  ;;  %p3211_p1 = por %p139_p12, %p37_p0 }
  0x1f   : > { %s3206_s11 = scalar_select %p58_p10, %s3055_s17, %s60_s5  }
  0x20   : > { %s3806_s12 = scalar_select %p3211_p1, 1, 0 }
  0x21   : > { %3805 = sst [smem:[#allocation18_spill]] %s3206_s11  ;;  %p3218_p2 = por %p145_p13, %p43_p3 }
  0x22   : > { %p2547_p7 = scmp.ge.s32.totalorder %s3071_s21, 1  ;;  %p152_p6 = scmp.lt.s32.totalorder %s3071_s21, 4 }
  0x23   : > { %s3807_s13 = scalar_select %p3218_p2, 1, 0 }
  0x24   : > { %p3224_p8 = pnand %p2547_p7, %p152_p6  ;;  %s3073_s15 = smov [#allocation9]  }
  0x25   : > { %s164_s23 = sshll.u32 %s3073_s15, 4  ;;  %s3810_s2 = sld [smem:[#allocation20_spill]]  ;;  %s165_s23 = int_to_ptr.vmem [resolvable:$true] %s164_s23 }
  0x26   : > { %s3808_s14 = scalar_select %p3224_p8, 1, 0 }
  0x27   : > { %p2748_p10 = pneg %p3224_p8 }
  0x29   : > { %p3232_p0 = pnand %p2748_p10, %p3788_p4 }
  0x2b   : > { %s2888_s6 = scalar_lea.hbm %s3810_s2, 384  ;;  %p2890_p6 = pneg %p3232_p0 }
  0x2c   : > { %p2889_p3 = scmp.ne.s32.totalorder %s3810_s2, %s2888_s6  ;;  %p2895_p7 = scmp.lt.u32.totalorder %s2888_s6, %s3810_s2 }
  0x2e   : > { %p2891_p12 = pnand %p2890_p6, %p2889_p3 }
  0x30   : > { %p2892_p13 = pneg %p2891_p12 }
  0x32   : > { %p2897_p10 = pnand %p2895_p7, %p2892_p13 }
  0x34   : > { %2900 = shalt.err (!%p2897_p10)
}
  0x35   : > { %s2901_s27 = scalar_lea.vmem %s165_s23, 384  ;;  %p2909_p11 = scmp.lt.s32.totalorder %s165_s23, %s165_s23 }
  0x36   : > { %p2902_p4 = scmp.ne.s32.totalorder %s165_s23, %s2901_s27  ;;  %p2910_p8 = scmp.lt.s32.totalorder %s2901_s27, %s2901_s27 }
  0x38   : > { %p2904_p2 = pnand %p2902_p4, %p2890_p6  ;;  %p2911_p9 = por %p2910_p8, %p2909_p11 }
  0x3a   : > { %p2905_p1 = pneg %p2904_p2 }
  0x3c   : > { %p2912_p5 = pnand %p2911_p9, %p2905_p1 }
  0x3e   : > { %2915 = shalt.err (!%p2912_p5)
}
  0x3f   : > { %s3074_s26 = smov 64   ;;  %s3075_s5 = smov 4  }
  0x40   : > { %2751 = dma.hbm_to_vmem [thread:$0]  (!%p3232_p0), %s3810_s2, 384, %s165_s23, [#allocation8], %s3074_s26, %s3074_s26, %s3075_s5  }
  0x41   : > { %p2549_p3 = scmp.ge.s32.totalorder %s3071_s21, 3 }
  0x42   : > { %p3811_p12 = scmp.ne.s32.totalorder (!%p2549_p3), %s3801_s28, 0 }
  0x43   : > { %177 = sbr.rel (%p2549_p3) target bundleno = 144 (0x90), region = 24 }
  0x4a   : > { %180 = sbr.rel (!%p3811_p12) target bundleno = 115 (0x73), region = 28  ;;  %s181_s27 = sand.u32 (%p3811_p12), 1, %s3067_s20  }
  0x4b   : > { %s3812_s30 = sshll.u32 (%p3811_p12), %s3071_s21, 3  ;;  %s2735_s15 = smul.u32 (%p3811_p12), 96, %s181_s27 }
  0x4c   : > { %s187_s6 = ssub.s32 (%p3811_p12), 25, %s3812_s30  ;;  %s3264_s26 = scalar_lea.sflag (%p3811_p12), [#allocation5], %s181_s27 }
  0x4d   : > { %p188_p4 = scmp.lt.s32.totalorder (%p3811_p12), %s187_s6, 8  ;;  %s185_s5 = scalar_lea.vmem (%p3811_p12), [#allocation4], %s2735_s15 }
  0x51   : > { %s3832_s6 = smov (!%p188_p4, %s187_s6), 8 }
  0x52   : > { %s3261_s25 = smul.u32 192, %s3832_s6 }
  0x54   : > { %s192_s23 = ssub.s32 1536, %s3261_s25 }
  0x55   : > { %193 = vsyncadd %s3264_s26, %s192_s23  ;;  %p2551_p5 = scmp.ne.s32.totalorder %s3261_s25, 0  ;;  %s2727_s28 = sshll.u32 %s3071_s21, 9 }
  0x56   : > { %s3813_s0 = sld [smem:[#allocation19_spill]]  ;;  %s2553_s27 = sshll.u32 %s3832_s6, 2 }
  0x57   : > { %s199_s2 = sshll.u32 %s185_s5, 4  ;;  %s3275_s2 = int_to_ptr.vmem [resolvable:$true] %s199_s2 }
  0x5c   : > { %s3272_s30 = scalar_lea.hbm %s3813_s0, %s2727_s28  ;;  %s2920_s11 = scalar_lea.hbm %s3813_s0, 4800 }
  0x5d   : > { %s2916_s15 = scalar_lea.hbm %s3272_s30, %s3261_s25  ;;  %p2921_p2 = scmp.lt.u32.totalorder %s3272_s30, %s3813_s0 }
  0x5e   : > { %p2917_p9 = scmp.ne.s32.totalorder %s3272_s30, %s2916_s15  ;;  %p2922_p8 = scmp.lt.u32.totalorder %s2920_s11, %s2916_s15 }
  0x5f   : > { %p2924_p6 = scmp.lt.u32.totalorder %s2916_s15, %s3272_s30 }
  0x60   : > { %p2918_p11 = pnand %p2917_p9, %p2551_p5  ;;  %p2923_p0 = por %p2922_p8, %p2921_p2 }
  0x62   : > { %p2919_p1 = pneg %p2918_p11  ;;  %p2925_p13 = por %p2924_p6, %p2923_p0 }
  0x64   : > { %p2926_p7 = pnand %p2925_p13, %p2919_p1 }
  0x66   : > { %2929 = shalt.err (!%p2926_p7)
}
  0x67   : > { %s2930_s5 = scalar_lea.vmem %s3275_s2, %s3261_s25  ;;  %s3076_s20 = smov [#allocation4]  }
  0x68   : > { %p2931_p10 = scmp.ne.s32.totalorder %s3275_s2, %s2930_s5  ;;  %s2934_s8 = sshll.u32 %s3076_s20, 4  ;;  %s2935_s8 = int_to_ptr.vmem [resolvable:$false] %s2934_s8 }
  0x69   : > { %s2936_s23 = scalar_lea.vmem %s2935_s8, 3072  ;;  %p2937_p4 = scmp.lt.s32.totalorder %s3275_s2, %s2935_s8 }
  0x6a   : > { %p2932_p3 = pnand %p2931_p10, %p2551_p5  ;;  %p2938_p9 = scmp.lt.s32.totalorder %s2936_s23, %s2930_s5 }
  0x6c   : > { %p2933_p12 = pneg %p2932_p3  ;;  %p2939_p11 = por %p2938_p9, %p2937_p4 }
  0x6e   : > { %p2940_p2 = pnand %p2939_p11, %p2933_p12 }
  0x70   : > { %2943 = shalt.err (!%p2940_p2)
}
  0x71   : > { %s3077_s11 = smov 1600   ;;  %s3078_s15 = smov 512  }
  0x72   : > { %205 = dma.hbm_to_vmem [thread:$0]  (%p2551_p5), %s3272_s30, %s3261_s25, %s3275_s2, %s3264_s26, %s3077_s11, %s3078_s15, %s2553_s27  }
  0x73 PF: > { %s209_s7 = sand.u32 1, %s3071_s21   ;;  %s211_s28 = sand.u32 1, %s3055_s17  }
  0x74   : > { %s2736_s5 = smul.u32 12, %s211_s28  ;;  %s2556_s20 = sshll.u32 %s3071_s21, 9 }
  0x75   : > { %s2477_s0 = scalar_lea.hbm %s3782_s1, %s2556_s20  ;;  %s3314_s25 = scalar_lea.sflag [#allocation8], %s209_s7 }
  0x76   : > { %s3310_s24 = scalar_lea.hbm %s2477_s0, 512  ;;  %s213_s6 = scalar_lea.vmem [#allocation7], %s2736_s5 }
  0x77   : > { %s221_s2 = sshll.u32 %s213_s6, 4  ;;  %s2972_s26 = scalar_lea.hbm %s2477_s0, 704  ;;  %s3312_s2 = int_to_ptr.vmem [resolvable:$true] %s221_s2 }
  0x78   : > { %p2945_p5 = scmp.ne.s32.totalorder %s3310_s24, %s2972_s26  ;;  %p3814_p1 = scmp.ne.s32.totalorder %s3803_s9, 0 }
  0x79   : > { %s2948_s11 = scalar_lea.hbm %s3782_s1, 4800  ;;  %p2949_p6 = scmp.lt.u32.totalorder %s3310_s24, %s3782_s1 }
  0x7a   : > { %p2946_p8 = pnand %p2945_p5, %p3814_p1  ;;  %p2950_p13 = scmp.lt.u32.totalorder %s2948_s11, %s2972_s26 }
  0x7b   : > { %p2952_p10 = scmp.lt.u32.totalorder %s2972_s26, %s3310_s24 }
  0x7c   : > { %p2947_p0 = pneg %p2946_p8  ;;  %p2951_p7 = por %p2950_p13, %p2949_p6 }
  0x7e   : > { %p2953_p3 = por %p2952_p10, %p2951_p7 }
  0x80   : > { %p2954_p12 = pnand %p2953_p3, %p2947_p0 }
  0x82   : > { %2957 = shalt.err (!%p2954_p12)
}
  0x83   : > { %s2958_s0 = scalar_lea.vmem %s3312_s2, 192  ;;  %s3079_s7 = smov [#allocation7]  }
  0x84   : > { %p2959_p4 = scmp.ne.s32.totalorder %s3312_s2, %s2958_s0  ;;  %s2962_s5 = sshll.u32 %s3079_s7, 4  ;;  %s2963_s5 = int_to_ptr.vmem [resolvable:$false] %s2962_s5 }
  0x85   : > { %s2964_s20 = scalar_lea.vmem %s2963_s5, 384  ;;  %p2965_p2 = scmp.lt.s32.totalorder %s3312_s2, %s2963_s5 }
  0x86   : > { %p2960_p9 = pnand %p2959_p4, %p3814_p1  ;;  %p2966_p5 = scmp.lt.s32.totalorder %s2964_s20, %s2958_s0 }
  0x88   : > { %p2961_p11 = pneg %p2960_p9  ;;  %p2967_p8 = por %p2966_p5, %p2965_p2 }
  0x8a   : > { %p2968_p6 = pnand %p2967_p8, %p2961_p11 }
  0x8c   : > { %2971 = shalt.err (!%p2968_p6)
}
  0x8d   : > { %s3080_s8 = smov 1600   ;;  %s3081_s23 = smov 64  }
  0x8e   : > { %s3082_s6 = smov 4  }
  0x8f   : > { %2741 = dma.hbm_to_vmem [thread:$0]  (%p3814_p1), %s3310_s24, 192, %s3312_s2, %s3314_s25, %s3080_s8, %s3081_s23, %s3082_s6  }
  0x90 PF: > { %p3815_p0 = scmp.ne.s32.totalorder %s3808_s14, 0 }
  0x91   : > { %s3340_s26 = sand.u32 (!%p3815_p0), 1, %s3063_s19   ;;  %p3816_p13 = scmp.ne.s32.totalorder (!%p3815_p0), %s3802_s29, 0 }
  0x92   : > { %233 = sbr.rel (%p3815_p0) target bundleno = 707 (0x2c3), region = 36  ;;  %s236_s27 = scalar_lea.sflag (!%p3815_p0), [#allocation5], %s3340_s26 }
  0x93   : > { %s2737_s30 = smul.u32 (!%p3815_p0), 96, %s3340_s26 }
  0x95   : > { %s3344_s11 = scalar_lea.vmem (!%p3815_p0), [#allocation4], %s2737_s30 }
  0x99   : > { %3030 = dma.done.wait (%p3816_p13), %s236_s27, 1536  }
  0x9a   : > { %3032 = vsyncadd (%p3816_p13), %s236_s27, 4294965760  ;;  %s244_s24 = sand.u32 1, %s3149_s22   ;;  %s246_s9 = sand.u32 1, %s3051_s16  }
  0x9b   : > { %s2738_s14 = smul.u32 12, %s246_s9  ;;  %s245_s2 = scalar_lea.sflag [#allocation8], %s244_s24 }
  0x9c   : > { %p3817_p1 = scmp.ne.s32.totalorder %s3804_s10, 0 }
  0x9d   : > { %s3352_s25 = scalar_lea.vmem [#allocation7], %s2738_s14 }
  0x9e   : > { %3034 = dma.done.wait (%p3817_p1), %s245_s2, 192  }
  0x9f   : > { %3036 = vsyncadd (%p3817_p1), %s245_s2, 4294967104  ;;  %p3818_p7 = scmp.eq.s32.totalorder %s3149_s22, 0 }
  0xa1   : > { %3038 = dma.done.wait (%p3818_p7), [#allocation8], 384   ;;  %p3819_p10 = pmov %p3818_p7 }
  0xa2   : > { %v3083_v0 = vmov 0   ;;  %v292_v1 = vld [vmem:[%s3344_s11 + $0x8] sm:$0xff]  ;;  %v291_v3 = vld [vmem:[%s3344_s11] sm:$0xff]  ;;  %v293_v6 = vld [vmem:[%s3344_s11 + $0x10] sm:$0xff]  ;;  %s3084_s29 = smov 127   ;;  %vm398_vm0 = vcmask 1040384  }
  0xa3   : > { %3040 = vsyncadd (%p3819_p10), [#allocation8], 4294966912  ;;  %496 = vmatprep.mubr.bf16.mxu1 %v3083_v0  ;;  %455 = vmatprep.mubr.bf16.mxu0 %v3083_v0  ;;  %v296_v2 = vld [vmem:[%s3344_s11 + $0x28] sm:$0xff]  ;;  %v295_v5 = vld [vmem:[%s3344_s11 + $0x20] sm:$0xff]  ;;  %vm394_vm1 = vcmask 146432   ;;  %s3085_s10 = smov 126  }
  0xa4   : > { %2829 = vset.pattern.permute.xlu0 %v3083_v0  ;;  %v3368_v4 = vcombine.high %v292_v1, %v296_v2  ;;  %v297_v7 = vld [vmem:[%s3344_s11 + $0x30] sm:$0xff]  ;;  %v3373_v8 = vcombine.low %v292_v1, %v296_v2  ;;  %v3375_v9 = vcombine.high %v291_v3, %v295_v5  ;;  %v299_v10 = vld [vmem:[%s3344_s11 + $0x40] sm:$0x11]  ;;  %v300_v11 = vld [vmem:[%s3344_s11 + $0x48] sm:$0x11]  ;;  %v3390_v17 = vcombine.low %v291_v3, %v295_v5  ;;  %s3086_s15 = smov 125  }
  0xa5   : > { %v301_v12 = vld [vmem:[%s3344_s11 + $0x50] sm:$0x11]  ;;  %v3382_v13 = vcombine.low %v293_v6, %v297_v7  ;;  %311 = vst [vmem:[#allocation2 + $0x48] sm:$0x11] %v299_v10  ;;  %312 = vst [vmem:[#allocation2 + $0x50] sm:$0x11] %v300_v11  ;;  %v3410_v30 = vcombine.high %v293_v6, %v297_v7 }
  0xa6   : > { %678 = vrot.lane.b32.xlu1 %v3368_v4, %s3084_s29  ;;  %313 = vst [vmem:[#allocation2 + $0x58] sm:$0x11] %v301_v12  ;;  %v294_v14 = vld [vmem:[%s3344_s11 + $0x18] sm:$0xff]  ;;  %v315_v16 = vld [vmem:[%s3352_s25] sm:$0xf]  ;;  %464 = vmatprep.subr.bf16.mxu1 %v3368_v4  ;;  %s3087_s28 = smov 124  }
  0xa7   : > { %v298_v15 = vld [vmem:[%s3344_s11 + $0x38] sm:$0xff]  ;;  %674 = vrot.lane.b32.xlu0 %v3375_v9, %s3084_s29  ;;  %v316_v18 = vld [vmem:[%s3352_s25 + $0x4] sm:$0xf]  ;;  %318 = vst [vmem:[#allocation2 + $0x20] sm:$0xf] %v315_v16  ;;  %465 = vmatpush1.bf16.msra.mxu1 %v3373_v8  ;;  %vm708_vm2 = vcmask 1039360  }
  0xa8   : > { %v302_v19 = vld [vmem:[%s3344_s11 + $0x58] sm:$0x11]  ;;  %v317_v20 = vld [vmem:[%s3352_s25 + $0x8] sm:$0x1]  ;;  %319 = vst [vmem:[#allocation2 + $0x44] sm:$0xf] %v316_v18  ;;  %423 = vmatprep.subr.bf16.mxu0 %v3375_v9  ;;  %v3408_v29 = vcombine.low %v294_v14, %v298_v15  ;;  %v3419_v40 = vcombine.high %v294_v14, %v298_v15 }
  0xa9   : > { %314 = vst [vmem:[#allocation2 + $0x60] sm:$0x11] %v302_v19  ;;  %320 = vst [vmem:[#allocation2 + $0x68] sm:$0x1] %v317_v20  ;;  %424 = vmatpush1.bf16.msra.mxu0 %v3390_v17  ;;  %v321_v41 = vld [vmem:[#allocation9] sm:$0x7] }
  0xaa   : > { %680 = vrot.lane.b32.xlu1 %v3382_v13, %s3084_s29  ;;  %s3088_s0 = smov 123   ;;  %vm1061_vm3 = vcmask 1031168   ;;  %vm1414_vm4 = vcmask 1022976   ;;  %vm1767_vm5 = vcmask 1014784   ;;  %vm2120_vm6 = vcmask 1006592   ;;  %s2559_s20 = sshll.u32 %s3340_s26, 5 }
  0xab   : > { %676 = vrot.lane.b32.xlu0 %v3373_v8, %s3084_s29  ;;  %s3718_s8 = scalar_lea.vmem [#allocation10], %s2559_s20  ;;  %s2732_s23 = sshll.u32 %s3149_s22, 9 }
  0xac   : > { %v607_v21 = vld [vmem:[#allocation2 + $0x48] sm:$0x11]  ;;  %v608_v22 = vld [vmem:[#allocation2 + $0x50] sm:$0x11]  ;;  %s2441_s6 = sshll.u32 %s3718_s8, 4  ;;  %s3728_s11 = scalar_lea.hbm %s3785_s4, %s2732_s23  ;;  %s3730_s6 = int_to_ptr.vmem [resolvable:$true] %s2441_s6 }
  0xad   : > { %v2593_v23 = vcombine.low %v607_v21, %v607_v21  ;;  %v2594_v24 = vcombine.high %v607_v21, %v607_v21  ;;  %v2595_v25 = vcombine.low %v608_v22, %v608_v22  ;;  %v609_v26 = vld [vmem:[#allocation2 + $0x58] sm:$0x11]  ;;  %v2596_v27 = vcombine.high %v608_v22, %v608_v22  ;;  %v331_v31 = vld [vmem:[#allocation2 + $0x50] sm:$0x11]  ;;  %v330_v32 = vld [vmem:[#allocation2 + $0x48] sm:$0x11] }
  0xae   : > { %v2597_v28 = vcombine.low %v609_v26, %v609_v26  ;;  %v2571_v33 = vcombine.high %v331_v31, %v331_v31  ;;  %v2570_v34 = vcombine.low %v331_v31, %v331_v31  ;;  %v2569_v35 = vcombine.high %v330_v32, %v330_v32  ;;  %v332_v42 = vld [vmem:[#allocation2 + $0x58] sm:$0x11]  ;;  %v960_v55 = vld [vmem:[#allocation2 + $0x48] sm:$0x11]  ;;  %v961_v57 = vld [vmem:[#allocation2 + $0x50] sm:$0x11] }
  0xaf   : > { %672 = vrot.lane.b32.xlu0 %v3390_v17, %s3084_s29  ;;  %690 = vrot.lane.b32.xlu1 %v2593_v23, %s3084_s29  ;;  %v2568_v36 = vcombine.low %v330_v32, %v330_v32  ;;  %v2835_v43 = vld [vmem:[#allocation2 + $0x20] ss:$36 sps:$4 sm:$0xff]   ;;  %v2573_v47 = vcombine.high %v332_v42, %v332_v42  ;;  %v2572_v48 = vcombine.low %v332_v42, %v332_v42  ;;  %v962_v60 = vld [vmem:[#allocation2 + $0x58] sm:$0x11]  ;;  %v1313_v7 = vld [vmem:[#allocation2 + $0x48] sm:$0x11] }
  0xb0   : > { %v333_v37 = vld [vmem:[#allocation2 + $0x60] sm:$0x11]  ;;  %2578 = vmatprep.subr.msk.bf16.mxu1 %vm398_vm0, %v2571_v33  ;;  %v406_v38 = vsel %vm398_vm0, %v2570_v34, 0  ;;  %2576 = vmatprep.subr.msk.bf16.mxu0 %vm398_vm0, %v2569_v35  ;;  %v2598_v49 = vcombine.high %v609_v26, %v609_v26  ;;  %v2838_v54 = vld [vmem:[#allocation2 + $0x68] ss:$0 sps:$4 sm:$0x11]   ;;  %v2619_v56 = vcombine.low %v960_v55, %v960_v55  ;;  %v2620_v58 = vcombine.high %v960_v55, %v960_v55 }
  0xb1   : > { %v400_v39 = vsel %vm398_vm0, %v2568_v36, 0  ;;  %467 = vmatpush1.bf16.msra.mxu1 %v406_v38  ;;  %v2574_v44 = vcombine.low %v333_v37, %v333_v37  ;;  %v610_v45 = vld [vmem:[#allocation2 + $0x60] sm:$0x11]  ;;  %v2575_v46 = vcombine.high %v333_v37, %v333_v37  ;;  %v412_v52 = vsel %vm398_vm0, %v2572_v48, 0  ;;  %v1314_v11 = vld [vmem:[#allocation2 + $0x50] sm:$0x11] }
  0xb2   : > { %426 = vmatpush1.bf16.msra.mxu0 %v400_v39  ;;  %546 = vmatprep.subr.bf16.mxu1 %v3419_v40  ;;  %v2599_v50 = vcombine.low %v610_v45, %v610_v45  ;;  %v2600_v53 = vcombine.high %v610_v45, %v610_v45  ;;  %v2621_v59 = vcombine.low %v961_v57, %v961_v57  ;;  %v2845_v63 = vld [vmem:[#allocation2 + $0x20] ss:$36 sps:$4 sm:$0xff]   ;;  %v2848_v6 = vld [vmem:[#allocation2 + $0x68] ss:$0 sps:$4 sm:$0x11]   ;;  %s2427_s24 = scalar_lea.sflag [#allocation6], %s3340_s26 }
  0xb3   : > { %692 = vrot.lane.b32.xlu0 %v2594_v24, %s3084_s29  ;;  %694 = vrot.lane.b32.xlu1 %v2595_v25, %s3084_s29  ;;  %v418_v51 = vsel %vm398_vm0, %v2574_v44, 0  ;;  %v2622_v61 = vcombine.high %v961_v57, %v961_v57  ;;  %v2623_v62 = vcombine.low %v962_v60, %v962_v60  ;;  %v963_v1 = vld [vmem:[#allocation2 + $0x60] sm:$0x11]  ;;  %v2624_v2 = vcombine.high %v962_v60, %v962_v60  ;;  %v1315_v15 = vld [vmem:[#allocation2 + $0x58] sm:$0x11]  ;;  %s2973_s9 = scalar_lea.vmem %s3730_s6, 512 }
  0xb4   : > { %505 = vmatprep.subr.bf16.mxu0 %v3410_v30  ;;  %2579 = vmatmul.mubr.msk.bf16.vlgmr.msra.gmra.mrb[0].mxu1 %vm394_vm1, %v321_v41  ;;  %v2625_v3 = vcombine.low %v963_v1, %v963_v1  ;;  %v2626_v5 = vcombine.high %v963_v1, %v963_v1  ;;  %v2645_v10 = vcombine.low %v1313_v7, %v1313_v7  ;;  %v2855_v19 = vld [vmem:[#allocation2 + $0x20] ss:$36 sps:$4 sm:$0xff]   ;;  %v2858_v24 = vld [vmem:[#allocation2 + $0x68] ss:$0 sps:$4 sm:$0x11]   ;;  %p2974_p3 = scmp.ne.s32.totalorder %s3730_s6, %s2973_s9  ;;  %p3820_p12 = scmp.ne.s32.totalorder %s3806_s12, 0 }
  0xb5   : > { %547 = vmatpush1.bf16.msra.mxu1 %v3408_v29  ;;  %2577 = vmatmul.mubr.msk.bf16.vlgmr.msra.gmra.mrb[0].mxu0 %vm394_vm1, %v321_v41  ;;  %v2646_v12 = vcombine.high %v1313_v7, %v1313_v7  ;;  %v2647_v14 = vcombine.low %v1314_v11, %v1314_v11  ;;  %v2648_v16 = vcombine.high %v1314_v11, %v1314_v11  ;;  %v1316_v20 = vld [vmem:[#allocation2 + $0x60] sm:$0x11]  ;;  %v1666_v25 = vld [vmem:[#allocation2 + $0x48] sm:$0x11]  ;;  %v1667_v31 = vld [vmem:[#allocation2 + $0x50] sm:$0x11] }
  0xb6   : > { %506 = vmatpush1.bf16.msra.mxu0 %v3382_v13  ;;  %2582 = vmatprep.subr.msk.bf16.mxu1 %vm398_vm0, %v2575_v46  ;;  %v2649_v18 = vcombine.low %v1315_v15, %v1315_v15  ;;  %v2650_v21 = vcombine.high %v1315_v15, %v1315_v15  ;;  %v2651_v22 = vcombine.low %v1316_v20, %v1316_v20  ;;  %v1668_v37 = vld [vmem:[#allocation2 + $0x58] sm:$0x11]  ;;  %p2975_p4 = pnand %p2974_p3, %p3820_p12  ;;  %s3089_s22 = smov [#allocation10]  }
  0xb7   : > { %696 = vrot.lane.b32.xlu0 %v2596_v27, %s3084_s29  ;;  %698 = vrot.lane.b32.xlu1 %v2597_v28, %s3084_s29  ;;  %v2652_v23 = vcombine.high %v1316_v20, %v1316_v20  ;;  %v2671_v27 = vcombine.low %v1666_v25, %v1666_v25  ;;  %v2672_v32 = vcombine.high %v1666_v25, %v1666_v25  ;;  %s2977_s14 = sshll.u32 %s3089_s22, 4  ;;  %s2978_s14 = int_to_ptr.vmem [resolvable:$false] %s2977_s14 }
  0xb8   : > { %2580 = vmatprep.subr.msk.bf16.mxu0 %vm398_vm0, %v2573_v47  ;;  %578 = vmatprep.mubr.bf16.mxu1 %v3083_v0  ;;  %v2673_v34 = vcombine.low %v1667_v31, %v1667_v31  ;;  %v2675_v42 = vcombine.low %v1668_v37, %v1668_v37  ;;  %p2976_p9 = pneg %p2975_p4  ;;  %s2979_s2 = scalar_lea.vmem %s2978_s14, 1024 }
  0xb9   : > { %549 = vmatpush1.bf16.msra.mxu1 %v418_v51  ;;  %537 = vmatprep.mubr.bf16.mxu0 %v3083_v0  ;;  %v2873_v51 = vld [vmem:[#allocation2 + $0x20] ss:$36 sps:$4 sm:$0xff]   ;;  %p2980_p11 = scmp.lt.s32.totalorder %s3730_s6, %s2978_s14  ;;  %p2981_p2 = scmp.lt.s32.totalorder %s2979_s2, %s2973_s9 }
  0xba   : > { %508 = vmatpush1.bf16.msra.mxu0 %v412_v52 }
  0xbb   : > { %682 = vrot.lane.b32.xlu0 %v3410_v30, %s3084_s29  ;;  %684 = vrot.lane.b32.xlu1 %v3408_v29, %s3084_s29  ;;  %p2982_p5 = por %p2981_p2, %p2980_p11 }
  0xbc   : > { %2583 = vmatmul.mubr.msk.bf16.vlgmr.msra.gmra.mrb[4].mxu1 %vm394_vm1, %v321_v41 }
  0xbd   : > { %833 = vmatprep.mubr.bf16.mxu1 %v3083_v0  ;;  %2581 = vmatmul.mubr.msk.bf16.vlgmr.msra.gmra.mrb[4].mxu0 %vm394_vm1, %v321_v41  ;;  %v2674_v41 = vcombine.high %v1667_v31, %v1667_v31  ;;  %p2983_p8 = pnand %p2982_p5, %p2976_p9 }
  0xbe   : > { %792 = vmatprep.mubr.bf16.mxu0 %v3083_v0 }
  0xbf   : > { %686 = vrot.lane.b32.xlu0 %v3419_v40, %s3084_s29  ;;  %688 = vrot.lane.b32.xlu1 %v2835_v43, %s3084_s29 }
  0xc3   : > { %700 = vrot.lane.b32.xlu0 %v2598_v49, %s3084_s29  ;;  %702 = vrot.lane.b32.xlu1 %v2599_v50, %s3084_s29 }
  0xc7   : > { %704 = vrot.lane.b32.xlu0 %v2600_v53, %s3084_s29  ;;  %706 = vrot.lane.b32.xlu1 %v2838_v54, %s3084_s29  ;;  %v1669_v53 = vld [vmem:[#allocation2 + $0x60] sm:$0x11] }
  0xc8   : > { %v2677_v60 = vcombine.low %v1669_v53, %v1669_v53 }
  0xcb   : > { %1027 = vrot.lane.b32.xlu0 %v3375_v9, %s3085_s10  ;;  %1029 = vrot.lane.b32.xlu1 %v3373_v8, %s3085_s10 }
  0xcf   : > { %1031 = vrot.lane.b32.xlu0 %v3368_v4, %s3085_s10  ;;  %1033 = vrot.lane.b32.xlu1 %v3382_v13, %s3085_s10 }
  0xd3   : > { %1025 = vrot.lane.b32.xlu0 %v3390_v17, %s3085_s10  ;;  %1043 = vrot.lane.b32.xlu1 %v2619_v56, %s3085_s10  ;;  %v3526_v56 = vld [vmem:[#allocation9 + $0x4] sm:$0x7] }
  0xd7   : > { %1045 = vrot.lane.b32.xlu0 %v2620_v58, %s3085_s10  ;;  %1047 = vrot.lane.b32.xlu1 %v2621_v59, %s3085_s10  ;;  %v2676_v59 = vcombine.high %v1668_v37, %v1668_v37 }
  0xdb   : > { %1049 = vrot.lane.b32.xlu0 %v2622_v61, %s3085_s10  ;;  %1051 = vrot.lane.b32.xlu1 %v2623_v62, %s3085_s10 }
  0xdf   : > { %1035 = vrot.lane.b32.xlu0 %v3410_v30, %s3085_s10  ;;  %1037 = vrot.lane.b32.xlu1 %v3408_v29, %s3085_s10 }
  0xe3   : > { %1039 = vrot.lane.b32.xlu0 %v3419_v40, %s3085_s10  ;;  %1041 = vrot.lane.b32.xlu1 %v2845_v63, %s3085_s10 }
  0xe7   : > { %1053 = vrot.lane.b32.xlu0 %v2624_v2, %s3085_s10  ;;  %1055 = vrot.lane.b32.xlu1 %v2625_v3, %s3085_s10  ;;  %v2678_v2 = vcombine.high %v1669_v53, %v1669_v53  ;;  %v2876_v3 = vld [vmem:[#allocation2 + $0x68] ss:$0 sps:$4 sm:$0x11]  }
  0xeb   : > { %1057 = vrot.lane.b32.xlu0 %v2626_v5, %s3085_s10  ;;  %1059 = vrot.lane.b32.xlu1 %v2848_v6, %s3085_s10 }
  0xef   : > { %1380 = vrot.lane.b32.xlu0 %v3375_v9, %s3086_s15  ;;  %1382 = vrot.lane.b32.xlu1 %v3373_v8, %s3086_s15 }
  0xf3   : > { %1384 = vrot.lane.b32.xlu0 %v3368_v4, %s3086_s15  ;;  %1386 = vrot.lane.b32.xlu1 %v3382_v13, %s3086_s15 }
  0xf7   : > { %1378 = vrot.lane.b32.xlu0 %v3390_v17, %s3086_s15  ;;  %1396 = vrot.lane.b32.xlu1 %v2645_v10, %s3086_s15 }
  0xfb   : > { %1398 = vrot.lane.b32.xlu0 %v2646_v12, %s3086_s15  ;;  %1400 = vrot.lane.b32.xlu1 %v2647_v14, %s3086_s15 }
  0xff   : > { %1402 = vrot.lane.b32.xlu0 %v2648_v16, %s3086_s15  ;;  %1404 = vrot.lane.b32.xlu1 %v2649_v18, %s3086_s15 }
 0x103   : > { %1388 = vrot.lane.b32.xlu0 %v3410_v30, %s3086_s15  ;;  %1390 = vrot.lane.b32.xlu1 %v3408_v29, %s3086_s15 }
 0x107   : > { %1392 = vrot.lane.b32.xlu0 %v3419_v40, %s3086_s15  ;;  %1394 = vrot.lane.b32.xlu1 %v2855_v19, %s3086_s15  ;;  %v2019_v19 = vld [vmem:[#allocation2 + $0x48] sm:$0x11] }
 0x10b   : > { %1406 = vrot.lane.b32.xlu0 %v2650_v21, %s3086_s15  ;;  %1408 = vrot.lane.b32.xlu1 %v2651_v22, %s3086_s15 }
 0x10f   : > { %1410 = vrot.lane.b32.xlu0 %v2652_v23, %s3086_s15  ;;  %1412 = vrot.lane.b32.xlu1 %v2858_v24, %s3086_s15  ;;  %v2020_v24 = vld [vmem:[#allocation2 + $0x50] sm:$0x11] }
 0x113   : > { %1733 = vrot.lane.b32.xlu0 %v3375_v9, %s3087_s28  ;;  %1735 = vrot.lane.b32.xlu1 %v3373_v8, %s3087_s28 }
 0x117   : > { %1737 = vrot.lane.b32.xlu0 %v3368_v4, %s3087_s28  ;;  %1739 = vrot.lane.b32.xlu1 %v3382_v13, %s3087_s28 }
 0x118   : > { %v679_v26 = vpop.permute.xlu1 %678 }
 0x119   : > { %v675_v28 = vpop.permute.xlu0 %674 }
 0x11b   : > { %1731 = vrot.lane.b32.xlu0 %v3390_v17, %s3087_s28  ;;  %1749 = vrot.lane.b32.xlu1 %v2671_v27, %s3087_s28 }
 0x11c   : > { %v681_v33 = vpop.permute.xlu1 %680 }
 0x11d   : > { %v677_v35 = vpop.permute.xlu0 %676  ;;  %v712_v36 = vsel %vm708_vm2, %v679_v26, %v681_v33 }
 0x11e   : > { %v711_v38 = vsel %vm708_vm2, %v677_v35, %v679_v26  ;;  %801 = vmatprep.subr.bf16.mxu1 %v712_v36  ;;  %v710_v39 = vsel %vm708_vm2, %v675_v28, %v677_v35  ;;  %v2698_v26 = vcombine.high %v2019_v19, %v2019_v19 }
 0x11f   : > { %1751 = vrot.lane.b32.xlu0 %v2672_v32, %s3087_s28  ;;  %760 = vmatprep.subr.bf16.mxu0 %v710_v39 }
 0x120   : > { %1753 = vrot.lane.b32.xlu1 %v2673_v34, %s3087_s28  ;;  %802 = vmatpush1.bf16.msra.mxu1 %v711_v38 }
 0x121   : > { %v673_v43 = vpop.permute.xlu0 %672  ;;  %v691_v44 = vpop.permute.xlu1 %690 }
 0x122   : > { %v709_v45 = vsel %vm708_vm2, %v673_v43, %v675_v28  ;;  %v2021_v28 = vld [vmem:[#allocation2 + $0x58] sm:$0x11] }
 0x123   : > { %1755 = vrot.lane.b32.xlu0 %v2674_v41, %s3087_s28  ;;  %761 = vmatpush1.bf16.msra.mxu0 %v709_v45  ;;  %v2701_v34 = vcombine.low %v2021_v28, %v2021_v28 }
 0x124   : > { %1757 = vrot.lane.b32.xlu1 %v2675_v42, %s3087_s28 }
 0x125   : > { %v693_v46 = vpop.permute.xlu0 %692  ;;  %v695_v47 = vpop.permute.xlu1 %694 }
 0x126   : > { %v717_v48 = vsel %vm708_vm2, %v691_v44, %v693_v46  ;;  %v718_v49 = vsel %vm708_vm2, %v693_v46, %v695_v47  ;;  %v2883_v44 = vld [vmem:[#allocation2 + $0x20] ss:$36 sps:$4 sm:$0xff]  }
 0x127   : > { %v737_v50 = vsel %vm398_vm0, %v717_v48, 0  ;;  %1741 = vrot.lane.b32.xlu0 %v3410_v30, %s3087_s28  ;;  %2602 = vmatprep.subr.msk.bf16.mxu0 %vm398_vm0, %v718_v49  ;;  %v2022_v46 = vld [vmem:[#allocation2 + $0x60] sm:$0x11]  ;;  %v949_v49 = vld [vmem:[#allocation9 + $0x8] sm:$0x7] }
 0x128   : > { %1743 = vrot.lane.b32.xlu1 %v3408_v29, %s3087_s28  ;;  %763 = vmatpush1.bf16.msra.mxu0 %v737_v50 }
 0x129   : > { %v697_v52 = vpop.permute.xlu0 %696  ;;  %v699_v54 = vpop.permute.xlu1 %698 }
 0x12a   : > { %v719_v55 = vsel %vm708_vm2, %v695_v47, %v697_v52  ;;  %v720_v57 = vsel %vm708_vm2, %v697_v52, %v699_v54 }
 0x12b   : > { %v743_v58 = vsel %vm398_vm0, %v719_v55, 0  ;;  %1745 = vrot.lane.b32.xlu0 %v3419_v40, %s3087_s28  ;;  %2604 = vmatprep.subr.msk.bf16.mxu1 %vm398_vm0, %v720_v57 }
 0x12c   : > { %1747 = vrot.lane.b32.xlu1 %v2873_v51, %s3087_s28  ;;  %804 = vmatpush1.bf16.msra.mxu1 %v743_v58 }
 0x12d   : > { %v683_v61 = vpop.permute.xlu0 %682  ;;  %2603 = vmatmul.mubr.msk.bf16.vlgmr.msra.gmra.mrb[8].mxu0 %vm394_vm1, %v3526_v56  ;;  %v685_v62 = vpop.permute.xlu1 %684 }
 0x12e   : > { %v713_v63 = vsel %vm708_vm2, %v681_v33, %v683_v61  ;;  %874 = vmatprep.mubr.bf16.mxu0 %v3083_v0  ;;  %v714_v1 = vsel %vm708_vm2, %v683_v61, %v685_v62  ;;  %v2700_v33 = vcombine.high %v2020_v24, %v2020_v24  ;;  %v2368_v61 = vld [vmem:[%s3784_s3] sm:$0x3f] }
 0x12f   : > { %1759 = vrot.lane.b32.xlu0 %v2676_v59, %s3087_s28  ;;  %842 = vmatprep.subr.bf16.mxu0 %v714_v1 }
 0x130   : > { %1761 = vrot.lane.b32.xlu1 %v2677_v60, %s3087_s28  ;;  %843 = vmatpush1.bf16.msra.mxu0 %v713_v63 }
 0x131   : > { %v687_v5 = vpop.permute.xlu0 %686  ;;  %2605 = vmatmul.mubr.msk.bf16.vlgmr.msra.gmra.mrb[8].mxu1 %vm394_vm1, %v3526_v56  ;;  %v689_v6 = vpop.permute.xlu1 %688 }
 0x132   : > { %v715_v7 = vsel %vm708_vm2, %v685_v62, %v687_v5  ;;  %915 = vmatprep.mubr.bf16.mxu1 %v3083_v0  ;;  %v716_v10 = vsel %vm708_vm2, %v687_v5, %v689_v6 }
 0x133   : > { %1763 = vrot.lane.b32.xlu0 %v2678_v2, %s3087_s28  ;;  %883 = vmatprep.subr.bf16.mxu1 %v716_v10 }
 0x134   : > { %1765 = vrot.lane.b32.xlu1 %v2876_v3, %s3087_s28  ;;  %884 = vmatpush1.bf16.msra.mxu1 %v715_v7 }
 0x135   : > { %v701_v11 = vpop.permute.xlu0 %700  ;;  %v703_v12 = vpop.permute.xlu1 %702 }
 0x136   : > { %v721_v14 = vsel %vm708_vm2, %v699_v54, %v701_v11  ;;  %v722_v15 = vsel %vm708_vm2, %v701_v11, %v703_v12 }
 0x137   : > { %v749_v16 = vsel %vm398_vm0, %v721_v14, 0  ;;  %2086 = vrot.lane.b32.xlu0 %v3375_v9, %s3088_s0  ;;  %2606 = vmatprep.subr.msk.bf16.mxu0 %vm398_vm0, %v722_v15 }
 0x138   : > { %2088 = vrot.lane.b32.xlu1 %v3373_v8, %s3088_s0  ;;  %845 = vmatpush1.bf16.msra.mxu0 %v749_v16  ;;  %v2697_v8 = vcombine.low %v2019_v19, %v2019_v19 }
 0x139   : > { %v705_v18 = vpop.permute.xlu0 %704  ;;  %v707_v20 = vpop.permute.xlu1 %706 }
 0x13a   : > { %v723_v21 = vsel %vm708_vm2, %v703_v12, %v705_v18  ;;  %v724_v22 = vsel %vm708_vm2, %v705_v18, %v707_v20 }
 0x13b   : > { %v755_v23 = vsel %vm398_vm0, %v723_v21, 0  ;;  %2090 = vrot.lane.b32.xlu0 %v3368_v4, %s3088_s0  ;;  %2608 = vmatprep.subr.msk.bf16.mxu1 %vm398_vm0, %v724_v22 }
 0x13c   : > { %2092 = vrot.lane.b32.xlu1 %v3382_v13, %s3088_s0  ;;  %886 = vmatpush1.bf16.msra.mxu1 %v755_v23  ;;  %v2699_v13 = vcombine.low %v2020_v24, %v2020_v24 }
 0x13d   : > { %v1028_v9 = vpop.permute.xlu0 %1027  ;;  %2607 = vmatmul.mubr.msk.bf16.vlgmr.msra.gmra.mrb[12].mxu0 %vm394_vm1, %v3526_v56  ;;  %v1030_v25 = vpop.permute.xlu1 %1029 }
 0x13e   : > { %1145 = vmatprep.mubr.bf16.mxu0 %v3083_v0  ;;  %v1063_v4 = vsel %vm1061_vm3, %v1028_v9, %v1030_v25 }
 0x13f   : > { %2084 = vrot.lane.b32.xlu0 %v3390_v17, %s3088_s0  ;;  %1113 = vmatprep.subr.bf16.mxu0 %v1063_v4 }
 0x140   : > { %2102 = vrot.lane.b32.xlu1 %v2697_v8, %s3088_s0  ;;  %2609 = vmatmul.mubr.msk.bf16.vlgmr.msra.gmra.mrb[12].mxu1 %vm394_vm1, %v3526_v56  ;;  %v2886_v56 = vld [vmem:[#allocation2 + $0x68] ss:$0 sps:$4 sm:$0x11]  }
 0x141   : > { %v1032_v27 = vpop.permute.xlu0 %1031  ;;  %v1034_v31 = vpop.permute.xlu1 %1033  ;;  %1186 = vmatprep.mubr.bf16.mxu1 %v3083_v0 }
 0x142   : > { %v1064_v32 = vsel %vm1061_vm3, %v1030_v25, %v1032_v27  ;;  %v1065_v17 = vsel %vm1061_vm3, %v1032_v27, %v1034_v31 }
 0x143   : > { %2104 = vrot.lane.b32.xlu0 %v2698_v26, %s3088_s0  ;;  %1154 = vmatprep.subr.bf16.mxu1 %v1065_v17 }
 0x144   : > { %2106 = vrot.lane.b32.xlu1 %v2699_v13, %s3088_s0  ;;  %1155 = vmatpush1.bf16.msra.mxu1 %v1064_v32  ;;  %v1302_v13 = vld [vmem:[#allocation9 + $0xc] sm:$0x7] }
 0x145   : > { %v1026_v35 = vpop.permute.xlu0 %1025  ;;  %v1044_v36 = vpop.permute.xlu1 %1043 }
 0x146   : > { %v1062_v37 = vsel %vm1061_vm3, %v1026_v35, %v1028_v9 }
 0x147   : > { %2108 = vrot.lane.b32.xlu0 %v2700_v33, %s3088_s0  ;;  %1114 = vmatpush1.bf16.msra.mxu0 %v1062_v37 }
 0x148   : > { %2110 = vrot.lane.b32.xlu1 %v2701_v34, %s3088_s0 }
 0x149   : > { %v1046_v38 = vpop.permute.xlu0 %1045  ;;  %v1048_v39 = vpop.permute.xlu1 %1047 }
 0x14a   : > { %v1070_v41 = vsel %vm1061_vm3, %v1044_v36, %v1046_v38  ;;  %v1071_v42 = vsel %vm1061_vm3, %v1046_v38, %v1048_v39 }
 0x14b   : > { %v1090_v43 = vsel %vm398_vm0, %v1070_v41, 0  ;;  %2094 = vrot.lane.b32.xlu0 %v3410_v30, %s3088_s0  ;;  %2628 = vmatprep.subr.msk.bf16.mxu0 %vm398_vm0, %v1071_v42  ;;  %v2702_v30 = vcombine.high %v2021_v28, %v2021_v28 }
 0x14c   : > { %2096 = vrot.lane.b32.xlu1 %v3408_v29, %s3088_s0  ;;  %1116 = vmatpush1.bf16.msra.mxu0 %v1090_v43  ;;  %v2703_v29 = vcombine.low %v2022_v46, %v2022_v46 }
 0x14d   : > { %v1050_v45 = vpop.permute.xlu0 %1049  ;;  %v1052_v47 = vpop.permute.xlu1 %1051 }
 0x14e   : > { %v1072_v48 = vsel %vm1061_vm3, %v1048_v39, %v1050_v45  ;;  %v1073_v50 = vsel %vm1061_vm3, %v1050_v45, %v1052_v47 }
 0x14f   : > { %v1096_v51 = vsel %vm398_vm0, %v1072_v48, 0  ;;  %2098 = vrot.lane.b32.xlu0 %v3419_v40, %s3088_s0  ;;  %2630 = vmatprep.subr.msk.bf16.mxu1 %vm398_vm0, %v1073_v50  ;;  %v2704_v40 = vcombine.high %v2022_v46, %v2022_v46 }
 0x150   : > { %2100 = vrot.lane.b32.xlu1 %v2883_v44, %s3088_s0  ;;  %1157 = vmatpush1.bf16.msra.mxu1 %v1096_v51 }
 0x151   : > { %v1036_v52 = vpop.permute.xlu0 %1035  ;;  %2629 = vmatmul.mubr.msk.bf16.vlgmr.msra.gmra.mrb[16].mxu0 %vm394_vm1, %v949_v49  ;;  %v1038_v53 = vpop.permute.xlu1 %1037 }
 0x152   : > { %v1066_v54 = vsel %vm1061_vm3, %v1034_v31, %v1036_v52  ;;  %1227 = vmatprep.mubr.bf16.mxu0 %v3083_v0  ;;  %v1067_v55 = vsel %vm1061_vm3, %v1036_v52, %v1038_v53 }
 0x153   : > { %2112 = vrot.lane.b32.xlu0 %v2702_v30, %s3088_s0  ;;  %1195 = vmatprep.subr.bf16.mxu0 %v1067_v55 }
 0x154   : > { %2114 = vrot.lane.b32.xlu1 %v2703_v29, %s3088_s0  ;;  %1196 = vmatpush1.bf16.msra.mxu0 %v1066_v54 }
 0x155   : > { %v1040_v57 = vpop.permute.xlu0 %1039  ;;  %2631 = vmatmul.mubr.msk.bf16.vlgmr.msra.gmra.mrb[16].mxu1 %vm394_vm1, %v949_v49  ;;  %v1042_v58 = vpop.permute.xlu1 %1041 }
 0x156   : > { %v1068_v59 = vsel %vm1061_vm3, %v1038_v53, %v1040_v57  ;;  %1268 = vmatprep.mubr.bf16.mxu1 %v3083_v0  ;;  %v1069_v60 = vsel %vm1061_vm3, %v1040_v57, %v1042_v58 }
 0x157   : > { %2116 = vrot.lane.b32.xlu0 %v2704_v40, %s3088_s0  ;;  %1236 = vmatprep.subr.bf16.mxu1 %v1069_v60 }
 0x158   : > { %2118 = vrot.lane.b32.xlu1 %v2886_v56, %s3088_s0  ;;  %1237 = vmatpush1.bf16.msra.mxu1 %v1068_v59 }
 0x159   : > { %v1054_v62 = vpop.permute.xlu0 %1053  ;;  %v1056_v63 = vpop.permute.xlu1 %1055 }
 0x15a   : > { %v1074_v1 = vsel %vm1061_vm3, %v1052_v47, %v1054_v62  ;;  %v1075_v2 = vsel %vm1061_vm3, %v1054_v62, %v1056_v63 }
 0x15b   : > { %v1102_v3 = vsel %vm398_vm0, %v1074_v1, 0  ;;  %2371 = vperm.xlu0 %2829, %v2368_v61   ;;  %2632 = vmatprep.subr.msk.bf16.mxu0 %vm398_vm0, %v1075_v2 }
 0x15c   : > { %1198 = vmatpush1.bf16.msra.mxu0 %v1102_v3 }
 0x15d   : > { %v1058_v5 = vpop.permute.xlu0 %1057  ;;  %v1060_v6 = vpop.permute.xlu1 %1059 }
 0x15e   : > { %v1076_v7 = vsel %vm1061_vm3, %v1056_v63, %v1058_v5  ;;  %v1077_v10 = vsel %vm1061_vm3, %v1058_v5, %v1060_v6 }
 0x15f   : > { %v1108_v11 = vsel %vm398_vm0, %v1076_v7, 0  ;;  %2634 = vmatprep.subr.msk.bf16.mxu1 %vm398_vm0, %v1077_v10  ;;  %2633 = vmatmul.mubr.msk.bf16.vlgmr.msra.gmra.mrb[20].mxu0 %vm394_vm1, %v949_v49  ;;  %v1655_v10 = vld [vmem:[#allocation9 + $0x10] sm:$0x7] }
 0x160   : > { %1239 = vmatpush1.bf16.msra.mxu1 %v1108_v11  ;;  %1498 = vmatprep.mubr.bf16.mxu0 %v3083_v0 }
 0x161   : > { %v1381_v12 = vpop.permute.xlu0 %1380  ;;  %v1383_v14 = vpop.permute.xlu1 %1382 }
 0x162   : > { %v1416_v15 = vsel %vm1414_vm4, %v1381_v12, %v1383_v14 }
 0x163   : > { %1466 = vmatprep.subr.bf16.mxu0 %v1416_v15  ;;  %2635 = vmatmul.mubr.msk.bf16.vlgmr.msra.gmra.mrb[20].mxu1 %vm394_vm1, %v949_v49 }
 0x164   : > { %1539 = vmatprep.mubr.bf16.mxu1 %v3083_v0 }
 0x165   : > { %v1385_v16 = vpop.permute.xlu0 %1384  ;;  %v1387_v18 = vpop.permute.xlu1 %1386 }
 0x166   : > { %v1417_v19 = vsel %vm1414_vm4, %v1383_v14, %v1385_v16  ;;  %v1418_v20 = vsel %vm1414_vm4, %v1385_v16, %v1387_v18 }
 0x167   : > { %1507 = vmatprep.subr.bf16.mxu1 %v1418_v20 }
 0x168   : > { %1508 = vmatpush1.bf16.msra.mxu1 %v1417_v19 }
 0x169   : > { %v1379_v21 = vpop.permute.xlu0 %1378  ;;  %v1397_v22 = vpop.permute.xlu1 %1396 }
 0x16a   : > { %v1415_v23 = vsel %vm1414_vm4, %v1379_v21, %v1381_v12 }
 0x16b   : > { %1467 = vmatpush1.bf16.msra.mxu0 %v1415_v23 }
 0x16d   : > { %v1399_v8 = vpop.permute.xlu0 %1398  ;;  %v1401_v9 = vpop.permute.xlu1 %1400 }
 0x16e   : > { %v1423_v24 = vsel %vm1414_vm4, %v1397_v22, %v1399_v8  ;;  %v1424_v25 = vsel %vm1414_vm4, %v1399_v8, %v1401_v9 }
 0x16f   : > { %v1443_v4 = vsel %vm398_vm0, %v1423_v24, 0  ;;  %2654 = vmatprep.subr.msk.bf16.mxu0 %vm398_vm0, %v1424_v25 }
 0x170   : > { %1469 = vmatpush1.bf16.msra.mxu0 %v1443_v4 }
 0x171   : > { %v1403_v26 = vpop.permute.xlu0 %1402  ;;  %v1405_v27 = vpop.permute.xlu1 %1404 }
 0x172   : > { %v1425_v28 = vsel %vm1414_vm4, %v1401_v9, %v1403_v26  ;;  %v1426_v31 = vsel %vm1414_vm4, %v1403_v26, %v1405_v27 }
 0x173   : > { %v1449_v32 = vsel %vm398_vm0, %v1425_v28, 0  ;;  %2656 = vmatprep.subr.msk.bf16.mxu1 %vm398_vm0, %v1426_v31  ;;  %2655 = vmatmul.mubr.msk.bf16.vlgmr.msra.gmra.mrb[24].mxu0 %vm394_vm1, %v1302_v13 }
 0x174   : > { %1510 = vmatpush1.bf16.msra.mxu1 %v1449_v32  ;;  %1580 = vmatprep.mubr.bf16.mxu0 %v3083_v0 }
 0x175   : > { %v1389_v17 = vpop.permute.xlu0 %1388  ;;  %v1391_v33 = vpop.permute.xlu1 %1390 }
 0x176   : > { %v1419_v34 = vsel %vm1414_vm4, %v1387_v18, %v1389_v17  ;;  %v1420_v35 = vsel %vm1414_vm4, %v1389_v17, %v1391_v33 }
 0x177   : > { %1548 = vmatprep.subr.bf16.mxu0 %v1420_v35  ;;  %2657 = vmatmul.mubr.msk.bf16.vlgmr.msra.gmra.mrb[24].mxu1 %vm394_vm1, %v1302_v13 }
 0x178   : > { %1549 = vmatpush1.bf16.msra.mxu0 %v1419_v34  ;;  %1621 = vmatprep.mubr.bf16.mxu1 %v3083_v0 }
 0x179   : > { %v1393_v36 = vpop.permute.xlu0 %1392  ;;  %v1395_v37 = vpop.permute.xlu1 %1394 }
 0x17a   : > { %v1421_v38 = vsel %vm1414_vm4, %v1391_v33, %v1393_v36  ;;  %v1422_v39 = vsel %vm1414_vm4, %v1393_v36, %v1395_v37 }
 0x17b   : > { %1589 = vmatprep.subr.bf16.mxu1 %v1422_v39 }
 0x17c   : > { %1590 = vmatpush1.bf16.msra.mxu1 %v1421_v38 }
 0x17d   : > { %v1407_v41 = vpop.permute.xlu0 %1406  ;;  %v1409_v42 = vpop.permute.xlu1 %1408 }
 0x17e   : > { %v1427_v43 = vsel %vm1414_vm4, %v1405_v27, %v1407_v41  ;;  %v1428_v44 = vsel %vm1414_vm4, %v1407_v41, %v1409_v42 }
 0x17f   : > { %v1455_v45 = vsel %vm398_vm0, %v1427_v43, 0  ;;  %2658 = vmatprep.subr.msk.bf16.mxu0 %vm398_vm0, %v1428_v44 }
 0x180   : > { %1551 = vmatpush1.bf16.msra.mxu0 %v1455_v45 }
 0x181   : > { %v1411_v46 = vpop.permute.xlu0 %1410  ;;  %v1413_v47 = vpop.permute.xlu1 %1412 }
 0x182   : > { %v1429_v48 = vsel %vm1414_vm4, %v1409_v42, %v1411_v46  ;;  %v1430_v49 = vsel %vm1414_vm4, %v1411_v46, %v1413_v47 }
 0x183   : > { %v1461_v50 = vsel %vm398_vm0, %v1429_v48, 0  ;;  %2660 = vmatprep.subr.msk.bf16.mxu1 %vm398_vm0, %v1430_v49  ;;  %2659 = vmatmul.mubr.msk.bf16.vlgmr.msra.gmra.mrb[28].mxu0 %vm394_vm1, %v1302_v13 }
 0x184   : > { %1592 = vmatpush1.bf16.msra.mxu1 %v1461_v50  ;;  %1851 = vmatprep.mubr.bf16.mxu0 %v3083_v0 }
 0x185   : > { %v1734_v51 = vpop.permute.xlu0 %1733  ;;  %v1736_v30 = vpop.permute.xlu1 %1735 }
 0x186   : > { %v1769_v29 = vsel %vm1767_vm5, %v1734_v51, %v1736_v30 }
 0x187   : > { %1819 = vmatprep.subr.bf16.mxu0 %v1769_v29  ;;  %2661 = vmatmul.mubr.msk.bf16.vlgmr.msra.gmra.mrb[28].mxu1 %vm394_vm1, %v1302_v13  ;;  %v498_v59 = vpop.f32.mrb[0].mxu1 }
 0x188   : > { %1892 = vmatprep.mubr.bf16.mxu1 %v3083_v0  ;;  %589 = vst [vmem:[#allocation3 + $0x10] sm:$0x3f] %v498_v59  ;;  %v500_v62 = vpop.f32.mrb[1].mxu1  ;;  %v457_v2 = vpop.f32.mrb[0].mxu0 }
 0x189   : > { %v1738_v52 = vpop.permute.xlu0 %1737  ;;  %v1740_v53 = vpop.permute.xlu1 %1739  ;;  %590 = vst [vmem:[#allocation3 + $0x18] sm:$0x3f] %v500_v62  ;;  %587 = vst [vmem:[#allocation3] sm:$0x3f] %v457_v2 }
 0x18a   : > { %v1770_v54 = vsel %vm1767_vm5, %v1736_v30, %v1738_v52  ;;  %v1771_v55 = vsel %vm1767_vm5, %v1738_v52, %v1740_v53  ;;  %v502_v3 = vpop.f32.mrb[2].mxu1  ;;  %v459_v5 = vpop.f32.mrb[1].mxu0 }
 0x18b   : > { %1860 = vmatprep.subr.bf16.mxu1 %v1771_v55  ;;  %v503_v6 = vpop.f32.mrb[3].mxu1  ;;  %588 = vst [vmem:[#allocation3 + $0x8] sm:$0x3f] %v459_v5  ;;  %v461_v11 = vpop.f32.mrb[2].mxu0 }
 0x18c   : > { %1861 = vmatpush1.bf16.msra.mxu1 %v1770_v54  ;;  %v462_v15 = vpop.f32.mrb[3].mxu0 }
 0x18d   : > { %v1732_v40 = vpop.permute.xlu0 %1731  ;;  %v1750_v56 = vpop.permute.xlu1 %1749 }
 0x18e   : > { %v1768_v57 = vsel %vm1767_vm5, %v1732_v40, %v1734_v51 }
 0x18f   : > { %1820 = vmatpush1.bf16.msra.mxu0 %v1768_v57  ;;  %v580_v20 = vpop.f32.mrb[4].mxu1 }
 0x190   : > { %593 = vst [vmem:[#allocation3 + $0x30] sm:$0x3f] %v580_v20  ;;  %v582_v23 = vpop.f32.mrb[5].mxu1  ;;  %v539_v9 = vpop.f32.mrb[4].mxu0  ;;  %v924_v20 = vld [vmem:[#allocation3] sm:$0x3f] }
 0x191   : > { %v1752_v58 = vpop.permute.xlu0 %1751  ;;  %594 = vst [vmem:[#allocation3 + $0x38] sm:$0x3f] %v582_v23  ;;  %v584_v24 = vpop.f32.mrb[6].mxu1  ;;  %591 = vst [vmem:[#allocation3 + $0x20] sm:$0x3f] %v539_v9 }
 0x192   : > { %v1754_v60 = vpop.permute.xlu1 %1753  ;;  %v1776_v61 = vsel %vm1767_vm5, %v1750_v56, %v1752_v58  ;;  %v541_v25 = vpop.f32.mrb[5].mxu0  ;;  %v2008_v56 = vld [vmem:[#allocation9 + $0x14] sm:$0x7]  ;;  %v926_v9 = vld [vmem:[#allocation3 + $0x10] sm:$0x3f] }
 0x193   : > { %v1777_v63 = vsel %vm1767_vm5, %v1752_v58, %v1754_v60  ;;  %v1796_v1 = vsel %vm398_vm0, %v1776_v61, 0  ;;  %v585_v4 = vpop.f32.mrb[7].mxu1  ;;  %592 = vst [vmem:[#allocation3 + $0x28] sm:$0x3f] %v541_v25  ;;  %v543_v13 = vpop.f32.mrb[6].mxu0 }
 0x194   : > { %2680 = vmatprep.subr.msk.bf16.mxu0 %vm398_vm0, %v1777_v63  ;;  %v544_v31 = vpop.f32.mrb[7].mxu0  ;;  %v927_v4 = vld [vmem:[#allocation3 + $0x18] sm:$0x3f] }
 0x195   : > { %1822 = vmatpush1.bf16.msra.mxu0 %v1796_v1  ;;  %v1756_v7 = vpop.permute.xlu0 %1755 }
 0x196   : > { %v1758_v12 = vpop.permute.xlu1 %1757  ;;  %v1778_v14 = vsel %vm1767_vm5, %v1754_v60, %v1756_v7 }
 0x197   : > { %v1779_v16 = vsel %vm1767_vm5, %v1756_v7, %v1758_v12  ;;  %v1802_v18 = vsel %vm398_vm0, %v1778_v14, 0 }
 0x198   : > { %2682 = vmatprep.subr.msk.bf16.mxu1 %vm398_vm0, %v1779_v16  ;;  %2681 = vmatmul.mubr.msk.bf16.vlgmr.msra.gmra.mrb[32].mxu0 %vm394_vm1, %v1655_v10 }
 0x199   : > { %1863 = vmatpush1.bf16.msra.mxu1 %v1802_v18  ;;  %v1742_v19 = vpop.permute.xlu0 %1741  ;;  %1933 = vmatprep.mubr.bf16.mxu0 %v3083_v0 }
 0x19a   : > { %v1744_v21 = vpop.permute.xlu1 %1743  ;;  %v1772_v22 = vsel %vm1767_vm5, %v1740_v53, %v1742_v19 }
 0x19b   : > { %v1773_v8 = vsel %vm1767_vm5, %v1742_v19, %v1744_v21 }
 0x19c   : > { %1901 = vmatprep.subr.bf16.mxu0 %v1773_v8  ;;  %2683 = vmatmul.mubr.msk.bf16.vlgmr.msra.gmra.mrb[32].mxu1 %vm394_vm1, %v1655_v10 }
 0x19d   : > { %1902 = vmatpush1.bf16.msra.mxu0 %v1772_v22  ;;  %v1746_v26 = vpop.permute.xlu0 %1745  ;;  %1974 = vmatprep.mubr.bf16.mxu1 %v3083_v0 }
 0x19e   : > { %v1748_v27 = vpop.permute.xlu1 %1747  ;;  %v1774_v28 = vsel %vm1767_vm5, %v1744_v21, %v1746_v26  ;;  %v925_v21 = vld [vmem:[#allocation3 + $0x8] sm:$0x3f] }
 0x19f   : > { %v1775_v32 = vsel %vm1767_vm5, %v1746_v26, %v1748_v27 }
 0x1a0   : > { %1942 = vmatprep.subr.bf16.mxu1 %v1775_v32 }
 0x1a1   : > { %1943 = vmatpush1.bf16.msra.mxu1 %v1774_v28  ;;  %v1760_v17 = vpop.permute.xlu0 %1759 }
 0x1a2   : > { %v1762_v33 = vpop.permute.xlu1 %1761  ;;  %v1780_v34 = vsel %vm1767_vm5, %v1758_v12, %v1760_v17 }
 0x1a3   : > { %v1781_v35 = vsel %vm1767_vm5, %v1760_v17, %v1762_v33  ;;  %v1808_v36 = vsel %vm398_vm0, %v1780_v34, 0  ;;  %v929_v34 = vld [vmem:[#allocation3 + $0x28] sm:$0x3f] }
 0x1a4   : > { %2684 = vmatprep.subr.msk.bf16.mxu0 %vm398_vm0, %v1781_v35 }
 0x1a5   : > { %1904 = vmatpush1.bf16.msra.mxu0 %v1808_v36  ;;  %v1764_v37 = vpop.permute.xlu0 %1763 }
 0x1a6   : > { %v1766_v38 = vpop.permute.xlu1 %1765  ;;  %v1782_v39 = vsel %vm1767_vm5, %v1762_v33, %v1764_v37  ;;  %v928_v33 = vld [vmem:[#allocation3 + $0x20] sm:$0x3f] }
 0x1a7   : > { %v1783_v41 = vsel %vm1767_vm5, %v1764_v37, %v1766_v38  ;;  %v1814_v42 = vsel %vm398_vm0, %v1782_v39, 0  ;;  %v930_v38 = vld [vmem:[#allocation3 + $0x30] sm:$0x3f] }
 0x1a8   : > { %2685 = vmatmul.mubr.msk.bf16.vlgmr.msra.gmra.mrb[36].mxu0 %vm394_vm1, %v1655_v10  ;;  %2686 = vmatprep.subr.msk.bf16.mxu1 %vm398_vm0, %v1783_v41 }
 0x1a9   : > { %1945 = vmatpush1.bf16.msra.mxu1 %v1814_v42  ;;  %v2087_v43 = vpop.permute.xlu0 %2086  ;;  %2204 = vmatprep.mubr.bf16.mxu0 %v3083_v0  ;;  %v931_v42 = vld [vmem:[#allocation3 + $0x38] sm:$0x3f] }
 0x1aa   : > { %v2089_v44 = vpop.permute.xlu1 %2088 }
 0x1ab   : > { %v2122_v45 = vsel %vm2120_vm6, %v2087_v43, %v2089_v44 }
 0x1ac   : > { %2687 = vmatmul.mubr.msk.bf16.vlgmr.msra.gmra.mrb[36].mxu1 %vm394_vm1, %v1655_v10  ;;  %2172 = vmatprep.subr.bf16.mxu0 %v2122_v45 }
 0x1ad   : > { %v2091_v46 = vpop.permute.xlu0 %2090  ;;  %2245 = vmatprep.mubr.bf16.mxu1 %v3083_v0 }
 0x1ae   : > { %v2093_v47 = vpop.permute.xlu1 %2092  ;;  %v2123_v48 = vsel %vm2120_vm6, %v2089_v44, %v2091_v46 }
 0x1af   : > { %v2124_v49 = vsel %vm2120_vm6, %v2091_v46, %v2093_v47 }
 0x1b0   : > { %2213 = vmatprep.subr.bf16.mxu1 %v2124_v49 }
 0x1b1   : > { %2214 = vmatpush1.bf16.msra.mxu1 %v2123_v48  ;;  %v2085_v50 = vpop.permute.xlu0 %2084 }
 0x1b2   : > { %v2103_v51 = vpop.permute.xlu1 %2102  ;;  %v2121_v30 = vsel %vm2120_vm6, %v2085_v50, %v2087_v43 }
 0x1b3   : > { %2173 = vmatpush1.bf16.msra.mxu0 %v2121_v30 }
 0x1b5   : > { %v2105_v29 = vpop.permute.xlu0 %2104 }
 0x1b6   : > { %v2107_v52 = vpop.permute.xlu1 %2106  ;;  %v2129_v53 = vsel %vm2120_vm6, %v2103_v51, %v2105_v29 }
 0x1b7   : > { %v2130_v54 = vsel %vm2120_vm6, %v2105_v29, %v2107_v52  ;;  %v2149_v55 = vsel %vm398_vm0, %v2129_v53, 0 }
 0x1b8   : > { %2706 = vmatprep.subr.msk.bf16.mxu0 %vm398_vm0, %v2130_v54 }
 0x1b9   : > { %2175 = vmatpush1.bf16.msra.mxu0 %v2149_v55  ;;  %v2109_v40 = vpop.permute.xlu0 %2108 }
 0x1ba   : > { %v2111_v57 = vpop.permute.xlu1 %2110  ;;  %v2131_v58 = vsel %vm2120_vm6, %v2107_v52, %v2109_v40 }
 0x1bb   : > { %v2132_v59 = vsel %vm2120_vm6, %v2109_v40, %v2111_v57  ;;  %v2155_v60 = vsel %vm398_vm0, %v2131_v58, 0 }
 0x1bc   : > { %2707 = vmatmul.mubr.msk.bf16.vlgmr.msra.gmra.mrb[40].mxu0 %vm394_vm1, %v2008_v56  ;;  %2708 = vmatprep.subr.msk.bf16.mxu1 %vm398_vm0, %v2132_v59 }
 0x1bd   : > { %2216 = vmatpush1.bf16.msra.mxu1 %v2155_v60  ;;  %v2095_v61 = vpop.permute.xlu0 %2094  ;;  %2286 = vmatprep.mubr.bf16.mxu0 %v3083_v0 }
 0x1be   : > { %v2097_v62 = vpop.permute.xlu1 %2096  ;;  %v2125_v63 = vsel %vm2120_vm6, %v2093_v47, %v2095_v61 }
 0x1bf   : > { %v2126_v1 = vsel %vm2120_vm6, %v2095_v61, %v2097_v62 }
 0x1c0   : > { %2709 = vmatmul.mubr.msk.bf16.vlgmr.msra.gmra.mrb[40].mxu1 %vm394_vm1, %v2008_v56  ;;  %2254 = vmatprep.subr.bf16.mxu0 %v2126_v1 }
 0x1c1   : > { %2255 = vmatpush1.bf16.msra.mxu0 %v2125_v63  ;;  %v2099_v2 = vpop.permute.xlu0 %2098  ;;  %2327 = vmatprep.mubr.bf16.mxu1 %v3083_v0 }
 0x1c2   : > { %v2101_v3 = vpop.permute.xlu1 %2100  ;;  %v2127_v5 = vsel %vm2120_vm6, %v2097_v62, %v2099_v2 }
 0x1c3   : > { %v2128_v6 = vsel %vm2120_vm6, %v2099_v2, %v2101_v3 }
 0x1c4   : > { %2295 = vmatprep.subr.bf16.mxu1 %v2128_v6 }
 0x1c5   : > { %2296 = vmatpush1.bf16.msra.mxu1 %v2127_v5  ;;  %v2113_v7 = vpop.permute.xlu0 %2112 }
 0x1c6   : > { %v2115_v10 = vpop.permute.xlu1 %2114  ;;  %v2133_v11 = vsel %vm2120_vm6, %v2111_v57, %v2113_v7 }
 0x1c7   : > { %v2134_v12 = vsel %vm2120_vm6, %v2113_v7, %v2115_v10  ;;  %v2161_v14 = vsel %vm398_vm0, %v2133_v11, 0 }
 0x1c8   : > { %2710 = vmatprep.subr.msk.bf16.mxu0 %vm398_vm0, %v2134_v12 }
 0x1c9   : > { %2257 = vmatpush1.bf16.msra.mxu0 %v2161_v14  ;;  %v2117_v15 = vpop.permute.xlu0 %2116 }
 0x1ca   : > { %v2119_v0 = vpop.permute.xlu1 %2118  ;;  %v2135_v16 = vsel %vm2120_vm6, %v2115_v10, %v2117_v15 }
 0x1cb   : > { %v2136_v18 = vsel %vm2120_vm6, %v2117_v15, %v2119_v0  ;;  %v2167_v19 = vsel %vm398_vm0, %v2135_v16, 0 }
 0x1cc   : > { %2711 = vmatmul.mubr.msk.bf16.vlgmr.msra.gmra.mrb[44].mxu0 %vm394_vm1, %v2008_v56  ;;  %2712 = vmatprep.subr.msk.bf16.mxu1 %vm398_vm0, %v2136_v18 }
 0x1cd   : > { %2298 = vmatpush1.bf16.msra.mxu1 %v2167_v19 }
 0x1d0   : > { %2713 = vmatmul.mubr.msk.bf16.vlgmr.msra.gmra.mrb[44].mxu1 %vm394_vm1, %v2008_v56 }
 0x200   : > { %v794_v22 = vpop.f32.mrb[8].mxu0 }
 0x201   : > { %v932_v23 = vadd.f32 %v924_v20, %v794_v22  ;;  %v796_v8 = vpop.f32.mrb[9].mxu0 }
 0x202   : > { %v933_v24 = vadd.f32 %v925_v21, %v796_v8  ;;  %v798_v25 = vpop.f32.mrb[10].mxu0 }
 0x203   : > { %940 = vst [vmem:[#allocation3] sm:$0x3f] %v932_v23  ;;  %v799_v26 = vpop.f32.mrb[11].mxu0 }
 0x204   : > { %v835_v13 = vpop.f32.mrb[8].mxu1  ;;  %941 = vst [vmem:[#allocation3 + $0x8] sm:$0x3f] %v933_v24 }
 0x205   : > { %v934_v27 = vadd.f32 %v926_v9, %v835_v13  ;;  %v837_v28 = vpop.f32.mrb[9].mxu1 }
 0x206   : > { %v935_v31 = vadd.f32 %v927_v4, %v837_v28  ;;  %v839_v32 = vpop.f32.mrb[10].mxu1 }
 0x207   : > { %942 = vst [vmem:[#allocation3 + $0x10] sm:$0x3f] %v934_v27  ;;  %v840_v17 = vpop.f32.mrb[11].mxu1 }
 0x208   : > { %943 = vst [vmem:[#allocation3 + $0x18] sm:$0x3f] %v935_v31 }
 0x20a   : > { %v1277_v50 = vld [vmem:[#allocation3] sm:$0x3f] }
 0x20b   : > { %v1278_v51 = vld [vmem:[#allocation3 + $0x8] sm:$0x3f] }
 0x20e   : > { %v1279_v53 = vld [vmem:[#allocation3 + $0x10] sm:$0x3f] }
 0x20f   : > { %v1280_v40 = vld [vmem:[#allocation3 + $0x18] sm:$0x3f] }
 0x210   : > { %v876_v35 = vpop.f32.mrb[12].mxu0 }
 0x211   : > { %v936_v36 = vadd.f32 %v928_v33, %v876_v35  ;;  %v878_v37 = vpop.f32.mrb[13].mxu0 }
 0x212   : > { %v937_v39 = vadd.f32 %v929_v34, %v878_v37  ;;  %v880_v41 = vpop.f32.mrb[14].mxu0 }
 0x213   : > { %944 = vst [vmem:[#allocation3 + $0x20] sm:$0x3f] %v936_v36  ;;  %v881_v43 = vpop.f32.mrb[15].mxu0  ;;  %v917_v44 = vpop.f32.mrb[12].mxu1 }
 0x214   : > { %945 = vst [vmem:[#allocation3 + $0x28] sm:$0x3f] %v937_v39  ;;  %v938_v45 = vadd.f32 %v930_v38, %v917_v44  ;;  %v919_v46 = vpop.f32.mrb[13].mxu1 }
 0x215   : > { %v939_v47 = vadd.f32 %v931_v42, %v919_v46  ;;  %v921_v48 = vpop.f32.mrb[14].mxu1 }
 0x216   : > { %946 = vst [vmem:[#allocation3 + $0x30] sm:$0x3f] %v938_v45  ;;  %v922_v49 = vpop.f32.mrb[15].mxu1 }
 0x217   : > { %947 = vst [vmem:[#allocation3 + $0x38] sm:$0x3f] %v939_v47 }
 0x21a   : > { %v1281_v63 = vld [vmem:[#allocation3 + $0x20] sm:$0x3f] }
 0x21b   : > { %v1282_v1 = vld [vmem:[#allocation3 + $0x28] sm:$0x3f] }
 0x21d   : > { %v1283_v6 = vld [vmem:[#allocation3 + $0x30] sm:$0x3f] }
 0x21e   : > { %v1284_v11 = vld [vmem:[#allocation3 + $0x38] sm:$0x3f] }
 0x224   : > { %v1147_v30 = vpop.f32.mrb[16].mxu0 }
 0x225   : > { %v1285_v29 = vadd.f32 %v1277_v50, %v1147_v30  ;;  %v1149_v52 = vpop.f32.mrb[17].mxu0 }
 0x226   : > { %v1286_v54 = vadd.f32 %v1278_v51, %v1149_v52  ;;  %v1151_v55 = vpop.f32.mrb[18].mxu0 }
 0x227   : > { %1293 = vst [vmem:[#allocation3] sm:$0x3f] %v1285_v29  ;;  %v1152_v56 = vpop.f32.mrb[19].mxu0 }
 0x228   : > { %v1188_v57 = vpop.f32.mrb[16].mxu1  ;;  %1294 = vst [vmem:[#allocation3 + $0x8] sm:$0x3f] %v1286_v54 }
 0x229   : > { %v1287_v58 = vadd.f32 %v1279_v53, %v1188_v57  ;;  %v1190_v59 = vpop.f32.mrb[17].mxu1 }
 0x22a   : > { %v1288_v60 = vadd.f32 %v1280_v40, %v1190_v59  ;;  %v1192_v61 = vpop.f32.mrb[18].mxu1 }
 0x22b   : > { %1295 = vst [vmem:[#allocation3 + $0x10] sm:$0x3f] %v1287_v58  ;;  %v1193_v62 = vpop.f32.mrb[19].mxu1 }
 0x22c   : > { %1296 = vst [vmem:[#allocation3 + $0x18] sm:$0x3f] %v1288_v60 }
 0x22e   : > { %v1630_v20 = vld [vmem:[#allocation3] sm:$0x3f] }
 0x22f   : > { %v1631_v21 = vld [vmem:[#allocation3 + $0x8] sm:$0x3f] }
 0x232   : > { %v1229_v2 = vpop.f32.mrb[20].mxu0  ;;  %v1632_v9 = vld [vmem:[#allocation3 + $0x10] sm:$0x3f] }
 0x233   : > { %v1289_v3 = vadd.f32 %v1281_v63, %v1229_v2  ;;  %v1231_v5 = vpop.f32.mrb[21].mxu0  ;;  %v1633_v4 = vld [vmem:[#allocation3 + $0x18] sm:$0x3f] }
 0x234   : > { %v1290_v7 = vadd.f32 %v1282_v1, %v1231_v5  ;;  %v1233_v10 = vpop.f32.mrb[22].mxu0 }
 0x235   : > { %1297 = vst [vmem:[#allocation3 + $0x20] sm:$0x3f] %v1289_v3  ;;  %v1234_v12 = vpop.f32.mrb[23].mxu0 }
 0x236   : > { %v1270_v14 = vpop.f32.mrb[20].mxu1  ;;  %1298 = vst [vmem:[#allocation3 + $0x28] sm:$0x3f] %v1290_v7 }
 0x237   : > { %v1291_v15 = vadd.f32 %v1283_v6, %v1270_v14  ;;  %v1272_v0 = vpop.f32.mrb[21].mxu1 }
 0x238   : > { %v1292_v16 = vadd.f32 %v1284_v11, %v1272_v0  ;;  %v1274_v18 = vpop.f32.mrb[22].mxu1 }
 0x239   : > { %1299 = vst [vmem:[#allocation3 + $0x30] sm:$0x3f] %v1291_v15  ;;  %v1275_v19 = vpop.f32.mrb[23].mxu1 }
 0x23a   : > { %1300 = vst [vmem:[#allocation3 + $0x38] sm:$0x3f] %v1292_v16 }
 0x23c   : > { %v1634_v33 = vld [vmem:[#allocation3 + $0x20] sm:$0x3f] }
 0x23d   : > { %v1635_v34 = vld [vmem:[#allocation3 + $0x28] sm:$0x3f] }
 0x240   : > { %v1636_v38 = vld [vmem:[#allocation3 + $0x30] sm:$0x3f] }
 0x241   : > { %v1637_v42 = vld [vmem:[#allocation3 + $0x38] sm:$0x3f] }
 0x246   : > { %v1500_v22 = vpop.f32.mrb[24].mxu0 }
 0x247   : > { %v1638_v23 = vadd.f32 %v1630_v20, %v1500_v22  ;;  %v1502_v8 = vpop.f32.mrb[25].mxu0 }
 0x248   : > { %v1639_v24 = vadd.f32 %v1631_v21, %v1502_v8  ;;  %v1504_v25 = vpop.f32.mrb[26].mxu0 }
 0x249   : > { %1646 = vst [vmem:[#allocation3] sm:$0x3f] %v1638_v23  ;;  %v1505_v26 = vpop.f32.mrb[27].mxu0 }
 0x24a   : > { %v1541_v13 = vpop.f32.mrb[24].mxu1  ;;  %1647 = vst [vmem:[#allocation3 + $0x8] sm:$0x3f] %v1639_v24 }
 0x24b   : > { %v1640_v27 = vadd.f32 %v1632_v9, %v1541_v13  ;;  %v1543_v28 = vpop.f32.mrb[25].mxu1 }
 0x24c   : > { %v1641_v31 = vadd.f32 %v1633_v4, %v1543_v28  ;;  %v1545_v32 = vpop.f32.mrb[26].mxu1 }
 0x24d   : > { %1648 = vst [vmem:[#allocation3 + $0x10] sm:$0x3f] %v1640_v27  ;;  %v1546_v17 = vpop.f32.mrb[27].mxu1 }
 0x24e   : > { %1649 = vst [vmem:[#allocation3 + $0x18] sm:$0x3f] %v1641_v31 }
 0x250   : > { %v1983_v50 = vld [vmem:[#allocation3] sm:$0x3f] }
 0x251   : > { %v1984_v51 = vld [vmem:[#allocation3 + $0x8] sm:$0x3f] }
 0x254   : > { %v1985_v53 = vld [vmem:[#allocation3 + $0x10] sm:$0x3f] }
 0x255   : > { %v1986_v40 = vld [vmem:[#allocation3 + $0x18] sm:$0x3f] }
 0x256   : > { %v1582_v35 = vpop.f32.mrb[28].mxu0 }
 0x257   : > { %v1642_v36 = vadd.f32 %v1634_v33, %v1582_v35  ;;  %v1584_v37 = vpop.f32.mrb[29].mxu0  ;;  %v2372_v33 = vpop.permute.xlu0 %2371 }
 0x258   : > { %v1643_v39 = vadd.f32 %v1635_v34, %v1584_v37  ;;  %v1586_v41 = vpop.f32.mrb[30].mxu0 }
 0x259   : > { %1650 = vst [vmem:[#allocation3 + $0x20] sm:$0x3f] %v1642_v36  ;;  %v1587_v43 = vpop.f32.mrb[31].mxu0 }
 0x25a   : > { %v1623_v44 = vpop.f32.mrb[28].mxu1  ;;  %1651 = vst [vmem:[#allocation3 + $0x28] sm:$0x3f] %v1643_v39 }
 0x25b   : > { %v1644_v45 = vadd.f32 %v1636_v38, %v1623_v44  ;;  %v1625_v46 = vpop.f32.mrb[29].mxu1 }
 0x25c   : > { %v1645_v47 = vadd.f32 %v1637_v42, %v1625_v46  ;;  %v1627_v48 = vpop.f32.mrb[30].mxu1 }
 0x25d   : > { %1652 = vst [vmem:[#allocation3 + $0x30] sm:$0x3f] %v1644_v45  ;;  %v1628_v49 = vpop.f32.mrb[31].mxu1 }
 0x25e   : > { %1653 = vst [vmem:[#allocation3 + $0x38] sm:$0x3f] %v1645_v47 }
 0x260   : > { %v1987_v1 = vld [vmem:[#allocation3 + $0x20] sm:$0x3f] }
 0x261   : > { %v1988_v5 = vld [vmem:[#allocation3 + $0x28] sm:$0x3f] }
 0x264   : > { %v1989_v12 = vld [vmem:[#allocation3 + $0x30] sm:$0x3f] }
 0x265   : > { %v1990_v0 = vld [vmem:[#allocation3 + $0x38] sm:$0x3f] }
 0x26b   : > { %v1853_v30 = vpop.f32.mrb[32].mxu0 }
 0x26c   : > { %v1991_v29 = vadd.f32 %v1983_v50, %v1853_v30  ;;  %v1855_v52 = vpop.f32.mrb[33].mxu0 }
 0x26d   : > { %v1992_v54 = vadd.f32 %v1984_v51, %v1855_v52  ;;  %v1857_v55 = vpop.f32.mrb[34].mxu0 }
 0x26e   : > { %1999 = vst [vmem:[#allocation3] sm:$0x3f] %v1991_v29  ;;  %v1858_v56 = vpop.f32.mrb[35].mxu0 }
 0x26f   : > { %v1894_v57 = vpop.f32.mrb[32].mxu1  ;;  %2000 = vst [vmem:[#allocation3 + $0x8] sm:$0x3f] %v1992_v54 }
 0x270   : > { %v1993_v58 = vadd.f32 %v1985_v53, %v1894_v57  ;;  %v1896_v59 = vpop.f32.mrb[33].mxu1 }
 0x271   : > { %v1994_v60 = vadd.f32 %v1986_v40, %v1896_v59  ;;  %v1898_v61 = vpop.f32.mrb[34].mxu1 }
 0x272   : > { %2001 = vst [vmem:[#allocation3 + $0x10] sm:$0x3f] %v1993_v58  ;;  %v1899_v62 = vpop.f32.mrb[35].mxu1 }
 0x273   : > { %2002 = vst [vmem:[#allocation3 + $0x18] sm:$0x3f] %v1994_v60 }
 0x275   : > { %v2336_v21 = vld [vmem:[#allocation3] sm:$0x3f] }
 0x276   : > { %v2337_v8 = vld [vmem:[#allocation3 + $0x8] sm:$0x3f] }
 0x279   : > { %v2338_v26 = vld [vmem:[#allocation3 + $0x10] sm:$0x3f] }
 0x27a   : > { %v2339_v28 = vld [vmem:[#allocation3 + $0x18] sm:$0x3f] }
 0x27b   : > { %v1935_v63 = vpop.f32.mrb[36].mxu0 }
 0x27c   : > { %v1995_v2 = vadd.f32 %v1987_v1, %v1935_v63  ;;  %v1937_v3 = vpop.f32.mrb[37].mxu0 }
 0x27d   : > { %v1996_v6 = vadd.f32 %v1988_v5, %v1937_v3  ;;  %v1939_v7 = vpop.f32.mrb[38].mxu0 }
 0x27e   : > { %2003 = vst [vmem:[#allocation3 + $0x20] sm:$0x3f] %v1995_v2  ;;  %v1940_v10 = vpop.f32.mrb[39].mxu0 }
 0x27f   : > { %2004 = vst [vmem:[#allocation3 + $0x28] sm:$0x3f] %v1996_v6  ;;  %v1976_v11 = vpop.f32.mrb[36].mxu1 }
 0x280   : > { %v1997_v14 = vadd.f32 %v1989_v12, %v1976_v11  ;;  %v1978_v15 = vpop.f32.mrb[37].mxu1 }
 0x281   : > { %v1998_v16 = vadd.f32 %v1990_v0, %v1978_v15  ;;  %v1980_v18 = vpop.f32.mrb[38].mxu1 }
 0x282   : > { %2005 = vst [vmem:[#allocation3 + $0x30] sm:$0x3f] %v1997_v14  ;;  %v1981_v19 = vpop.f32.mrb[39].mxu1 }
 0x283   : > { %2006 = vst [vmem:[#allocation3 + $0x38] sm:$0x3f] %v1998_v16 }
 0x285   : > { %v2340_v47 = vld [vmem:[#allocation3 + $0x20] sm:$0x3f] }
 0x286   : > { %v2341_v51 = vld [vmem:[#allocation3 + $0x28] sm:$0x3f] }
 0x289   : > { %v2342_v40 = vld [vmem:[#allocation3 + $0x30] sm:$0x3f] }
 0x28a   : > { %v2343_v58 = vld [vmem:[#allocation3 + $0x38] sm:$0x3f] }
 0x28f   : > { %v2206_v20 = vpop.f32.mrb[40].mxu0 }
 0x290   : > { %v2344_v22 = vadd.f32 %v2336_v21, %v2206_v20  ;;  %v2208_v23 = vpop.f32.mrb[41].mxu0 }
 0x291   : > { %v2345_v9 = vadd.f32 %v2337_v8, %v2208_v23  ;;  %v2210_v24 = vpop.f32.mrb[42].mxu0 }
 0x292   : > { %2352 = vst [vmem:[#allocation3] sm:$0x3f] %v2344_v22  ;;  %v2211_v25 = vpop.f32.mrb[43].mxu0 }
 0x293   : > { %2353 = vst [vmem:[#allocation3 + $0x8] sm:$0x3f] %v2345_v9  ;;  %v2247_v4 = vpop.f32.mrb[40].mxu1 }
 0x294   : > { %v2346_v13 = vadd.f32 %v2338_v26, %v2247_v4  ;;  %v2249_v27 = vpop.f32.mrb[41].mxu1 }
 0x295   : > { %v2347_v31 = vadd.f32 %v2339_v28, %v2249_v27  ;;  %v2251_v32 = vpop.f32.mrb[42].mxu1 }
 0x296   : > { %2354 = vst [vmem:[#allocation3 + $0x10] sm:$0x3f] %v2346_v13  ;;  %v2252_v17 = vpop.f32.mrb[43].mxu1 }
 0x297   : > { %2355 = vst [vmem:[#allocation3 + $0x18] sm:$0x3f] %v2347_v31 }
 0x299   : > { %v2360_v34 = vld [vmem:[#allocation3] sm:$0x3f] }
 0x29a   : > { %v2361_v35 = vld [vmem:[#allocation3 + $0x8] sm:$0x3f]  ;;  %v2374_v36 = vadd.f32 %v2372_v33, %v2360_v34 }
 0x29b   : > { %v2375_v37 = vadd.f32 %v2372_v33, %v2361_v35 }
 0x29c   : > { %v2382_v38 = vmax.f32 %v2374_v36, 0.0 }
 0x29d   : > { %v2362_v39 = vld [vmem:[#allocation3 + $0x10] sm:$0x3f]  ;;  %v2383_v41 = vmax.f32 %v2375_v37, 0.0 }
 0x29e   : > { %v2363_v42 = vld [vmem:[#allocation3 + $0x18] sm:$0x3f]  ;;  %v2376_v43 = vadd.f32 %v2372_v33, %v2362_v39 }
 0x29f   : > { %v2377_v44 = vadd.f32 %v2372_v33, %v2363_v42  ;;  %v2728_v45 = vpack.c.bf16 %v2383_v41, %v2382_v38  ;;  %v2288_v46 = vpop.f32.mrb[44].mxu0 }
 0x2a0   : > { %v2384_v48 = vmax.f32 %v2376_v43, 0.0  ;;  %v2348_v49 = vadd.f32 %v2340_v47, %v2288_v46  ;;  %v2290_v50 = vpop.f32.mrb[45].mxu0 }
 0x2a1   : > { %v2385_v30 = vmax.f32 %v2377_v44, 0.0  ;;  %v2349_v29 = vadd.f32 %v2341_v51, %v2290_v50  ;;  %v2292_v52 = vpop.f32.mrb[46].mxu0  ;;  %2422 = vst [vmem:[%s3718_s8] sm:$0x77] %v2728_v45 }
 0x2a2   : > { %2356 = vst [vmem:[#allocation3 + $0x20] sm:$0x3f] %v2348_v49  ;;  %v2293_v53 = vpop.f32.mrb[47].mxu0 }
 0x2a3   : > { %v2729_v54 = vpack.c.bf16 %v2385_v30, %v2384_v48  ;;  %2357 = vst [vmem:[#allocation3 + $0x28] sm:$0x3f] %v2349_v29  ;;  %v2329_v55 = vpop.f32.mrb[44].mxu1 }
 0x2a4   : > { %v2350_v56 = vadd.f32 %v2342_v40, %v2329_v55  ;;  %v2331_v57 = vpop.f32.mrb[45].mxu1 }
 0x2a5   : > { %v2351_v59 = vadd.f32 %v2343_v58, %v2331_v57  ;;  %v2333_v60 = vpop.f32.mrb[46].mxu1  ;;  %2423 = vst [vmem:[%s3718_s8 + $0x8] sm:$0x77] %v2729_v54 }
 0x2a6   : > { %2358 = vst [vmem:[#allocation3 + $0x30] sm:$0x3f] %v2350_v56  ;;  %v2334_v61 = vpop.f32.mrb[47].mxu1 }
 0x2a7   : > { %2359 = vst [vmem:[#allocation3 + $0x38] sm:$0x3f] %v2351_v59 }
 0x2a9   : > { %v2364_v62 = vld [vmem:[#allocation3 + $0x20] sm:$0x3f] }
 0x2aa   : > { %v2365_v63 = vld [vmem:[#allocation3 + $0x28] sm:$0x3f]  ;;  %v2378_v1 = vadd.f32 %v2372_v33, %v2364_v62 }
 0x2ab   : > { %v2379_v2 = vadd.f32 %v2372_v33, %v2365_v63 }
 0x2ac   : > { %v2386_v3 = vmax.f32 %v2378_v1, 0.0 }
 0x2ad   : > { %v2366_v5 = vld [vmem:[#allocation3 + $0x30] sm:$0x3f]  ;;  %v2387_v6 = vmax.f32 %v2379_v2, 0.0 }
 0x2ae   : > { %v2367_v7 = vld [vmem:[#allocation3 + $0x38] sm:$0x3f]  ;;  %v2380_v10 = vadd.f32 %v2372_v33, %v2366_v5 }
 0x2af   : > { %v2381_v11 = vadd.f32 %v2372_v33, %v2367_v7  ;;  %v2730_v12 = vpack.c.bf16 %v2387_v6, %v2386_v3 }
 0x2b0   : > { %v2388_v14 = vmax.f32 %v2380_v10, 0.0 }
 0x2b1   : > { %v2389_v15 = vmax.f32 %v2381_v11, 0.0  ;;  %2424 = vst [vmem:[%s3718_s8 + $0x10] sm:$0x77] %v2730_v12 }
 0x2b3   : > { %v2731_v0 = vpack.c.bf16 %v2389_v15, %v2388_v14 }
 0x2b5   : > { %2425 = vst [vmem:[%s3718_s8 + $0x18] sm:$0x77] %v2731_v0 }
 0x2b6   : > { %2986 = shalt.err (!%p2983_p8)
}
 0x2b7   : > { %s2987_s26 = scalar_lea.hbm %s3728_s11, 512  ;;  %s2991_s10 = scalar_lea.hbm %s3785_s4, 1536 }
 0x2b8   : > { %p2988_p6 = scmp.ne.s32.totalorder %s3728_s11, %s2987_s26  ;;  %p2992_p1 = scmp.lt.u32.totalorder %s3728_s11, %s3785_s4 }
 0x2b9   : > { %p2993_p7 = scmp.lt.u32.totalorder %s2991_s10, %s2987_s26  ;;  %p2995_p3 = scmp.lt.u32.totalorder %s2987_s26, %s3728_s11 }
 0x2ba   : > { %p2989_p0 = pnand %p2988_p6, %p3820_p12 }
 0x2bb   : > { %p2994_p10 = por %p2993_p7, %p2992_p1 }
 0x2bc   : > { %p2990_p13 = pneg %p2989_p0 }
 0x2bd   : > { %p2996_p4 = por %p2995_p3, %p2994_p10 }
 0x2bf   : > { %p2997_p9 = pnand %p2996_p4, %p2990_p13 }
 0x2c1   : > { %3000 = shalt.err (!%p2997_p9)
}
 0x2c2   : > { %2746 = dma.vmem_to_hbm [thread:$0]  (%p3820_p12), %s3730_s6, 512, %s3728_s11, %s2427_s24  }
 0x2c3 PF: > { %p2758_p11 = scmp.ge.s32.totalorder %s3071_s21, 2  ;;  %s2453_s0 = sand.u32 1, %s3059_s18  }
 0x2c4   : > { %p3821_p2 = scmp.ne.s32.totalorder %s3807_s13, 0  ;;  %s2454_s7 = scalar_lea.sflag [#allocation6], %s2453_s0 }
 0x2c6   : > { %p2753_p5 = pnand %p2758_p11, %p3821_p2 }
 0x2c8   : > { %3042 = dma.done.wait (!%p2753_p5), %s2454_s7, 512  }
 0x2c9   : > { %3044 = vsyncadd (!%p2753_p5), %s2454_s7, 4294966784  ;;  %s3822_s21 = sld [smem:[#allocation16_spill]]  ;;  %s3823_s5 = sld [smem:[#allocation18_spill]] }
 0x2ca   : > { %s3824_s12 = sld [smem:[#allocation15_spill]]  ;;  %s3825_s20 = sld [smem:[#allocation17_spill]] }
 0x2cb   : > { %s3826_s15 = smov %s3051_s16  ;;  %s3827_s16 = smov %s3055_s17 }
 0x2cc   : > { %s3829_s18 = smov %s3063_s19 }
 0x2cf   : > { %p20_p12 = scmp.ge.s32.totalorder %s3822_s21, 5   ;;  %s3828_s17 = smov %s3823_s5 }
 0x2d0   : > { %s3830_s19 = smov %s3824_s12 }
 0x2d1   :  { %22 = sbr.rel (!%p20_p12) target bundleno = 12 (0xc), region = 103 }
 0x2d8   :  { %2459 = vsyncpa [#allocation5], 1 }
 0x2d9   :  { %2461 = vsyncpa [#allocation5 + $0x1], 1 }
 0x2da   :  { %2462 = vsyncpa [#allocation8], 1 }
 0x2db   :  { %2464 = vsyncpa [#allocation8 + $0x1], 1 }
 0x2dc   :  { %2465 = vsyncpa [#allocation6], 1 }
 0x2dd   :  { %2467 = vsyncpa [#allocation6 + $0x1], 1 }

</bundles_post_ra>
